<compile_context>
chip_gen: v5e
topology: v5e:2x2
jax: 0.10.0
libtpu: 0.0.40
codegen_flags: <defaults>
</compile_context>

<pallas_src>
import functools
import math

import jax
import jax.numpy as jnp
from jax.experimental import pallas as pl
from jax.experimental.pallas import tpu as pltpu


def transf_atten_rel_kernel(
    k_ref, query_ref, vp_ref, pos_ref, mask_ref, hm_ref,
    wq_ref, bq_ref, wr_ref, u_ref, vb_ref, wo_ref, bo_ref,
    gamma_ref, beta_ref,
    out_ref,
    *, num_heads, head_dim, scaled, eps):
    f32 = jnp.float32
    bf16 = jnp.bfloat16
    nh = num_heads

    TQ = query_ref.shape[1]          # query rows in this tile
    L = k_ref.shape[1]               # key length (full)
    H = query_ref.shape[2]           # hidden

    q_in = query_ref[0]              # [TQ, H] f32 (kept for the residual)
    k = k_ref[0]                     # [L,  H] bf16 (already projected)
    v = vp_ref[0]                    # [L,  H] bf16 (already projected)
    pos_in = pos_ref[0]              # [TQ, L, H] bf16 (largest tensor)
    mask = mask_ref[...]             # [1, 1, L]  1.0 = valid key
    hm = hm_ref[...]                 # [nh, H]    hm[h, c] = 1 if column c in head h

    def mm(a, b):                    # A @ B, bf16 operands, f32 accumulate
        return jax.lax.dot_general(
            a.astype(bf16), b.astype(bf16),
            (((1,), (0,)), ((), ())), preferred_element_type=f32)

    def mm_t(a, b):                  # A @ B^T (contract last dims), bf16 -> f32
        return jax.lax.dot_general(
            a.astype(bf16), b.astype(bf16),
            (((1,), (1,)), ((), ())), preferred_element_type=f32)

    # ---- query projection (MXU, bf16 in / f32 accum) ----------------------
    q = mm(q_in, wq_ref[...]) + bq_ref[...]            # [TQ, H]

    q_u = q + u_ref[...]                               # u, v passed as [1, H]
    q_v = q + vb_ref[...]

    # heads-batched copies: qx*[i, h, c] = (q + u/v)[i, c] * 1{c in head h}
    qxu = (q_u[:, None, :] * hm[None, :, :]).reshape(TQ * nh, H)
    qxv = (q_v[:, None, :] * hm[None, :, :]).reshape(TQ * nh, H)

    # ---- A + C term: (q_h + u_h) . k_h  (all heads, one matmul) -----------
    ac = mm_t(qxu, k).reshape(TQ, nh, L)               # [TQ, nh, L]

    # ---- B + D term (re-associated) ----------------------------------------
    # t[i,h,m] = sum_d (q+v)[i,h,d] * Wr[m, h*dh + d]
    t3 = mm_t(qxv, wr_ref[...]).reshape(TQ, nh, H)     # [TQ, nh, H] f32
    # bd[i,h,j] = sum_m t[i,h,m] * pos[i,j,m]  (batched over i; bf16 operands,
    # f32 accumulate -> single-pass MXU; pos arrives bf16 from HBM).
    bd = jax.lax.dot_general(
        t3.astype(bf16), pos_in,
        (((2,), (2,)), ((0,), (0,))),
        preferred_element_type=f32)                    # [TQ, nh, L]
    # (Wr-bias term omitted: constant across keys, cancels in softmax.)

    scale = (1.0 / math.sqrt(head_dim)) if scaled else 1.0
    scores = (ac + bd) * scale                         # [TQ, nh, L]
    # key mask, applied once for all heads
    scores = jnp.where(mask > 0.0, scores, -1e15)

    # ---- softmax over keys (f32, VPU/EUP) ----------------------------------
    m = jnp.max(scores, axis=-1, keepdims=True)
    e = jnp.exp(scores - m)
    s = jnp.sum(e, axis=-1, keepdims=True)
    p = e * pl.reciprocal(s, approx=True)              # [TQ, nh, L]

    # ---- attention output, all heads at once --------------------------------
    o_full = mm(p.reshape(TQ * nh, L), v).reshape(TQ, nh, H)    # [TQ, nh, H]
    attn_vec = jnp.sum(o_full * hm[None, :, :], axis=1)         # [TQ, H]

    # ---- BertSelfOutput: dense + residual + LayerNorm -----------------------
    hidden = mm(attn_vec, wo_ref[...]) + bo_ref[...]
    x = hidden + q_in
    mu = jnp.mean(x, axis=-1, keepdims=True)
    var = jnp.mean((x - mu) ** 2, axis=-1, keepdims=True)
    xn = (x - mu) * jax.lax.rsqrt(var + eps)
    out_ref[0] = (xn * gamma_ref[...] + beta_ref[...]).astype(out_ref.dtype)


def _pick_tq(L, H, nh, pos_buffers, vmem_limit_bytes):
    """Pick the query-row tile so the full working set fits the VMEM budget.

    Accounts for the multi-buffered bf16 pos tile, double-buffered bf16
    weights and k/v blocks, and the nh-expanded f32 temporaries.  Only
    multiple-of-8 divisors of L (or L itself) are returned so the output /
    query block second-to-last dim stays sublane-legal."""
    fixed = (3 * H * H * 2 * 2          # Wq / Wr / Wo (bf16, double-buffered)
             + 2 * L * H * 2 * 2        # k_proj / v_proj blocks (bf16, 2 bufs)
             + nh * H * 4 * 2           # head-column mask
             + 16 * H * 4               # biases / u / v / gamma / beta / mask
             + 2 * (1 << 20))           # compiler scratch slack
    per_row = (pos_buffers * L * H * 2  # pos tile (bf16, multi-buffered)
               + 2 * 2 * H * 4          # query-in + output blocks (f32, 2 bufs)
               + 3 * nh * H * 4         # qxu / qxv / o_full f32 temporaries
               + 4 * nh * L * 4)        # ac / bd / scores / softmax temporaries
    budget = int(vmem_limit_bytes * 0.85) - fixed
    rows = max(1, budget // per_row)
    if rows >= L:
        return L
    divs = [t for t in range(8, L, 8) if L % t == 0]
    fitting = [t for t in divs if t <= rows]
    if fitting:
        return max(fitting)
    # No sublane-legal divisor fits the budget: take the smallest legal one
    # (may spill a little, but compiles) or the full length as last resort.
    return min(divs) if divs else L


def transf_atten_rel(key_x, query_x, value_x, pos, seq_mask, params, *,
                     num_heads, scaled=True, eps=1e-12, tq=None,
                     pos_buffers=2, vmem_limit_bytes=None):
    B, L, H = query_x.shape
    d = H // num_heads
    nh = num_heads
    f32, bf16 = jnp.float32, jnp.bfloat16

    # k / v projections hoisted out of the kernel: one XLA GEMM each instead
    # of a recompute per query tile; streamed into the kernel as bf16.
    k_proj = (jnp.dot(key_x, params["wk"]) + params["bk"]).astype(bf16)
    v_proj = (jnp.dot(value_x, params["wv"]) + params["bv"]).astype(bf16)

    # pos is the dominant HBM stream -> cast once on the host so the
    # HBM->VMEM DMA itself is halved (not just the matmul operand).
    pos_bf16 = pos.astype(bf16)

    # Remaining in-kernel weights as bf16 (halves their double-buffered VMEM).
    wq = params["wq"].astype(bf16)
    wr = params["wr"].astype(bf16)
    wo = params["wo"].astype(bf16)

    mask3 = seq_mask.astype(f32).reshape(B, 1, L)
    u2 = params["u"].reshape(1, H).astype(f32)
    v2 = params["v"].reshape(1, H).astype(f32)
    # head-column selector: hm[h, c] = 1 iff column c belongs to head h
    hm = jnp.repeat(jnp.eye(nh, dtype=f32), d, axis=1)              # [nh, H]

    # ---- generation-aware VMEM budgeting -----------------------------------
    if vmem_limit_bytes is None:
        try:
            info = pltpu.get_tpu_info()
            vmem_cap = int(getattr(info, "vmem_capacity_bytes", 64 << 20))
        except Exception:
            vmem_cap = 64 << 20            # conservative (v7x-sized) fallback
        # v5e/v6e (128 MiB) -> 96 MiB; v7x (64 MiB) -> 48 MiB.
        vmem_limit_bytes = max(32 << 20,
                               min(int(vmem_cap * 0.75), vmem_cap - (16 << 20)))
    vmem_limit_bytes = int(vmem_limit_bytes)

    if tq is None:
        tq = _pick_tq(L, H, nh, max(2, pos_buffers), vmem_limit_bytes)
    nqt = L // tq

    kernel = functools.partial(
        transf_atten_rel_kernel,
        num_heads=nh, head_dim=d, scaled=scaled, eps=eps)

    kv_spec = pl.BlockSpec((1, L, H), lambda b, t: (b, 0, 0))
    q_spec = pl.BlockSpec((1, tq, H), lambda b, t: (b, t, 0))
    if pos_buffers > 2:
        # Deeper pos pipelining (v5e/v6e only, where the extra tile fits VMEM).
        pos_spec = pl.BlockSpec((1, tq, L, H), lambda b, t: (b, t, 0, 0),
                                pipeline_mode=pl.Buffered(pos_buffers))
    else:
        pos_spec = pl.BlockSpec((1, tq, L, H), lambda b, t: (b, t, 0, 0))
    mask_spec = pl.BlockSpec((1, 1, L), lambda b, t: (b, 0, 0))
    hm_spec = pl.BlockSpec((nh, H), lambda b, t: (0, 0))
    w_spec = pl.BlockSpec((H, H), lambda b, t: (0, 0))
    b_spec = pl.BlockSpec((1, H), lambda b, t: (0, 0))

    grid_spec = pltpu.PrefetchScalarGridSpec(
        num_scalar_prefetch=0,
        grid=(B, nqt),
        in_specs=[
            kv_spec,            # k (pre-projected, bf16)
            q_spec,             # query (raw f32; also the residual)
            kv_spec,            # v (pre-projected, bf16)
            pos_spec,           # pos (bf16, dominant stream)
            mask_spec, hm_spec,
            w_spec, b_spec,     # wq, bq
            w_spec,             # wr
            b_spec, b_spec,     # u, v
            w_spec, b_spec,     # wo, bo
            b_spec, b_spec,     # gamma, beta
        ],
        out_specs=pl.BlockSpec((1, tq, H), lambda b, t: (b, t, 0)),
    )

    return pl.pallas_call(
        kernel,
        out_shape=jax.ShapeDtypeStruct((B, L, H), jnp.float32),
        grid_spec=grid_spec,
        compiler_params=pltpu.CompilerParams(
            dimension_semantics=("parallel", "parallel"),
            vmem_limit_bytes=vmem_limit_bytes),
    )(k_proj, query_x, v_proj, pos_bf16, mask3, hm,
      wq, params["bq"], wr, u2, v2, wo, params["bo"],
      params["gamma"], params["beta"])


def init_params(key, H, num_heads):
    d = H // num_heads
    ks = jax.random.split(key, 14)
    s = 1.0 / math.sqrt(H)
    p = {}
    for i, n in enumerate(["wk", "wq", "wv", "wr", "wo"]):
        p[n] = jax.random.uniform(ks[i], (H, H), jnp.float32, -s, s)
    for i, n in enumerate(["bk", "bq", "bv", "br", "bo"]):
        p[n] = jax.random.uniform(ks[5 + i], (1, H), jnp.float32, -s, s)
    p["u"] = 0.1 * jax.random.normal(ks[10], (num_heads, d), jnp.float32)
    p["v"] = 0.1 * jax.random.normal(ks[11], (num_heads, d), jnp.float32)
    p["gamma"] = 1.0 + 0.05 * jax.random.normal(ks[12], (1, H), jnp.float32)
    p["beta"] = 0.05 * jax.random.normal(ks[13], (1, H), jnp.float32)
    return p


def reference(key_x, query_x, value_x, pos, seq_mask, P, num_heads, scaled, eps):
    # Pure-JAX f32 reference mirroring the PyTorch forward (inference mode).
    B, L, H = query_x.shape
    d = H // num_heads
    hp = jax.lax.Precision.HIGHEST
    q = jnp.dot(query_x, P["wq"], precision=hp) + P["bq"]
    k = jnp.dot(key_x, P["wk"], precision=hp) + P["bk"]
    v = jnp.dot(value_x, P["wv"], precision=hp) + P["bv"]
    r = jnp.dot(pos, P["wr"], precision=hp) + P["br"]
    qh = q.reshape(B, L, num_heads, d)
    kh = k.reshape(B, L, num_heads, d)
    vh = v.reshape(B, L, num_heads, d)
    rh = r.reshape(B, L, L, num_heads, d)
    ac = jnp.einsum("bihd,bjhd->bhij", qh + P["u"][None, None], kh, precision=hp)
    bd = jnp.einsum("bihd,bijhd->bhij", qh + P["v"][None, None], rh, precision=hp)
    score = ac + bd
    if scaled:
        score = score / math.sqrt(d)
    mask = seq_mask[:, None, None, :].astype(bool)
    score = jnp.where(mask, score, -1e15)
    p = jax.nn.softmax(score, axis=-1)
    o = jnp.einsum("bhij,bjhd->bihd", p, vh, precision=hp).reshape(B, L, H)
    hidden = jnp.dot(o, P["wo"], precision=hp) + P["bo"]
    x = hidden + query_x
    mu = x.mean(-1, keepdims=True)
    var = ((x - mu) ** 2).mean(-1, keepdims=True)
    return (x - mu) / jnp.sqrt(var + eps) * P["gamma"] + P["beta"]


if __name__ == "__main__":
    B, L, H, NH = 2, 8, 64, 8
    root = jax.random.PRNGKey(0)
    k1, k2, k3, k4, k5 = jax.random.split(root, 5)
    key_x = jax.random.normal(k1, (B, L, H), jnp.float32)
    query_x = jax.random.normal(k2, (B, L, H), jnp.float32)
    value_x = jax.random.normal(k3, (B, L, H), jnp.float32)
    pos = jax.random.normal(k4, (B, L, L, H), jnp.float32)
    lengths = jnp.array([L, 5])
    seq_mask = (jnp.arange(L)[None, :] < lengths[:, None]).astype(jnp.float32)

    params = init_params(k5, H, NH)

    out = transf_atten_rel(key_x, query_x, value_x, pos, seq_mask, params,
                           num_heads=NH, scaled=True, eps=1e-12)
    out = jax.block_until_ready(out)

    ref = reference(key_x, query_x, value_x, pos, seq_mask, params, NH, True, 1e-12)
    err = float(jnp.max(jnp.abs(out - ref)))
    # bf16 MXU operands / bf16 pos stream (f32 accumulate) -> loose tolerance.
    assert jnp.allclose(out, ref, atol=5e-2, rtol=5e-2), f"max abs err {err}"

    print("KERNEL_OK")
</pallas_src>

<mosaic_0001>
module attributes {stable_mosaic.version = 11 : i64} {
  func.func @transf_atten_rel_kernel(%arg0: i32, %arg1: i32, %arg2: memref<1x8x64xbf16, #tpu.memory_space<vmem>>, %arg3: memref<1x8x64xf32, #tpu.memory_space<vmem>>, %arg4: memref<1x8x64xbf16, #tpu.memory_space<vmem>>, %arg5: memref<1x8x8x64xbf16, #tpu.memory_space<vmem>>, %arg6: memref<1x1x8xf32, #tpu.memory_space<vmem>>, %arg7: memref<8x64xf32, #tpu.memory_space<vmem>>, %arg8: memref<64x64xbf16, #tpu.memory_space<vmem>>, %arg9: memref<1x64xf32, #tpu.memory_space<vmem>>, %arg10: memref<64x64xbf16, #tpu.memory_space<vmem>>, %arg11: memref<1x64xf32, #tpu.memory_space<vmem>>, %arg12: memref<1x64xf32, #tpu.memory_space<vmem>>, %arg13: memref<64x64xbf16, #tpu.memory_space<vmem>>, %arg14: memref<1x64xf32, #tpu.memory_space<vmem>>, %arg15: memref<1x64xf32, #tpu.memory_space<vmem>>, %arg16: memref<1x64xf32, #tpu.memory_space<vmem>>, %arg17: memref<1x8x64xf32, #tpu.memory_space<vmem>>) attributes {dimension_semantics = [#tpu.dimension_semantics<parallel>, #tpu.dimension_semantics<parallel>], iteration_bounds = array<i64: 2, 1>, scalar_prefetch = 0 : i64, scratch_operands = 0 : i64, tpu.core_type = #tpu.core_type<tc>, window_params = [{transform_indices = @transform_0, window_bounds = array<i64: 1, 8, 64>}, {transform_indices = @transform_1, window_bounds = array<i64: 1, 8, 64>}, {transform_indices = @transform_2, window_bounds = array<i64: 1, 8, 64>}, {transform_indices = @transform_3, window_bounds = array<i64: 1, 8, 8, 64>}, {transform_indices = @transform_4, window_bounds = array<i64: 1, 1, 8>}, {pipeline_mode = #tpu.pipeline_mode<synchronous>, transform_indices = @transform_5, window_bounds = array<i64: 8, 64>}, {pipeline_mode = #tpu.pipeline_mode<synchronous>, transform_indices = @transform_6, window_bounds = array<i64: 64, 64>}, {pipeline_mode = #tpu.pipeline_mode<synchronous>, transform_indices = @transform_7, window_bounds = array<i64: 1, 64>}, {pipeline_mode = #tpu.pipeline_mode<synchronous>, transform_indices = @transform_8, window_bounds = array<i64: 64, 64>}, {pipeline_mode = #tpu.pipeline_mode<synchronous>, transform_indices = @transform_9, window_bounds = array<i64: 1, 64>}, {pipeline_mode = #tpu.pipeline_mode<synchronous>, transform_indices = @transform_10, window_bounds = array<i64: 1, 64>}, {pipeline_mode = #tpu.pipeline_mode<synchronous>, transform_indices = @transform_11, window_bounds = array<i64: 64, 64>}, {pipeline_mode = #tpu.pipeline_mode<synchronous>, transform_indices = @transform_12, window_bounds = array<i64: 1, 64>}, {pipeline_mode = #tpu.pipeline_mode<synchronous>, transform_indices = @transform_13, window_bounds = array<i64: 1, 64>}, {pipeline_mode = #tpu.pipeline_mode<synchronous>, transform_indices = @transform_14, window_bounds = array<i64: 1, 64>}, {transform_indices = @transform_15, window_bounds = array<i64: 1, 8, 64>}]} {
    %c0 = arith.constant 0 : index
    %c0_0 = arith.constant 0 : index
    %c0_1 = arith.constant 0 : index
    %0 = vector.load %arg3[%c0, %c0_0, %c0_1] : memref<1x8x64xf32, #tpu.memory_space<vmem>>, vector<1x8x64xf32>
    %1 = vector.shape_cast %0 : vector<1x8x64xf32> to vector<8x64xf32>
    %c0_2 = arith.constant 0 : index
    %c0_3 = arith.constant 0 : index
    %c0_4 = arith.constant 0 : index
    %2 = vector.load %arg2[%c0_2, %c0_3, %c0_4] : memref<1x8x64xbf16, #tpu.memory_space<vmem>>, vector<1x8x64xbf16>
    %3 = vector.shape_cast %2 : vector<1x8x64xbf16> to vector<8x64xbf16>
    %c0_5 = arith.constant 0 : index
    %c0_6 = arith.constant 0 : index
    %c0_7 = arith.constant 0 : index
    %4 = vector.load %arg4[%c0_5, %c0_6, %c0_7] : memref<1x8x64xbf16, #tpu.memory_space<vmem>>, vector<1x8x64xbf16>
    %5 = vector.shape_cast %4 : vector<1x8x64xbf16> to vector<8x64xbf16>
    %c0_8 = arith.constant 0 : index
    %c0_9 = arith.constant 0 : index
    %c0_10 = arith.constant 0 : index
    %c0_11 = arith.constant 0 : index
    %6 = vector.load %arg5[%c0_8, %c0_9, %c0_10, %c0_11] : memref<1x8x8x64xbf16, #tpu.memory_space<vmem>>, vector<1x8x8x64xbf16>
    %7 = vector.shape_cast %6 : vector<1x8x8x64xbf16> to vector<8x8x64xbf16>
    %c0_12 = arith.constant 0 : index
    %c0_13 = arith.constant 0 : index
    %c0_14 = arith.constant 0 : index
    %8 = vector.load %arg6[%c0_12, %c0_13, %c0_14] : memref<1x1x8xf32, #tpu.memory_space<vmem>>, vector<1x1x8xf32>
    %c0_15 = arith.constant 0 : index
    %c0_16 = arith.constant 0 : index
    %9 = vector.load %arg7[%c0_15, %c0_16] : memref<8x64xf32, #tpu.memory_space<vmem>>, vector<8x64xf32>
    %c0_17 = arith.constant 0 : index
    %c0_18 = arith.constant 0 : index
    %10 = vector.load %arg8[%c0_17, %c0_18] : memref<64x64xbf16, #tpu.memory_space<vmem>>, vector<64x64xbf16>
    %11 = arith.truncf %1 : vector<8x64xf32> to vector<8x64xbf16>
    %cst = arith.constant dense<0.000000e+00> : vector<8x64xf32>
    %12 = tpu.matmul %11, %10, %cst {dimension_numbers = #tpu.dot_dimension_numbers<[1], [0], [0], [1], [0, 0, 1, 1], [], []>} : vector<8x64xbf16>, vector<64x64xbf16>, vector<8x64xf32> -> vector<8x64xf32>
    %c0_19 = arith.constant 0 : index
    %c0_20 = arith.constant 0 : index
    %13 = vector.load %arg9[%c0_19, %c0_20] : memref<1x64xf32, #tpu.memory_space<vmem>>, vector<1x64xf32>
    %14 = vector.broadcast %13 : vector<1x64xf32> to vector<8x64xf32>
    %15 = arith.addf %12, %14 : vector<8x64xf32>
    %c0_21 = arith.constant 0 : index
    %c0_22 = arith.constant 0 : index
    %16 = vector.load %arg11[%c0_21, %c0_22] : memref<1x64xf32, #tpu.memory_space<vmem>>, vector<1x64xf32>
    %17 = vector.broadcast %16 : vector<1x64xf32> to vector<8x64xf32>
    %18 = arith.addf %15, %17 : vector<8x64xf32>
    %c0_23 = arith.constant 0 : index
    %c0_24 = arith.constant 0 : index
    %19 = vector.load %arg12[%c0_23, %c0_24] : memref<1x64xf32, #tpu.memory_space<vmem>>, vector<1x64xf32>
    %20 = vector.broadcast %19 : vector<1x64xf32> to vector<8x64xf32>
    %21 = arith.addf %15, %20 : vector<8x64xf32>
    %22 = vector.shape_cast %18 : vector<8x64xf32> to vector<8x1x64xf32>
    %23 = vector.shape_cast %9 : vector<8x64xf32> to vector<1x8x64xf32>
    %24 = vector.broadcast %22 : vector<8x1x64xf32> to vector<8x8x64xf32>
    %25 = vector.broadcast %23 : vector<1x8x64xf32> to vector<8x8x64xf32>
    %26 = arith.mulf %24, %25 : vector<8x8x64xf32>
    %27 = vector.shape_cast %26 : vector<8x8x64xf32> to vector<64x64xf32>
    %28 = vector.shape_cast %21 : vector<8x64xf32> to vector<8x1x64xf32>
    %29 = vector.shape_cast %9 : vector<8x64xf32> to vector<1x8x64xf32>
    %30 = vector.broadcast %28 : vector<8x1x64xf32> to vector<8x8x64xf32>
    %31 = vector.broadcast %29 : vector<1x8x64xf32> to vector<8x8x64xf32>
    %32 = arith.mulf %30, %31 : vector<8x8x64xf32>
    %33 = vector.shape_cast %32 : vector<8x8x64xf32> to vector<64x64xf32>
    %34 = arith.truncf %27 : vector<64x64xf32> to vector<64x64xbf16>
    %cst_25 = arith.constant dense<0.000000e+00> : vector<64x8xf32>
    %35 = tpu.matmul %34, %3, %cst_25 {dimension_numbers = #tpu.dot_dimension_numbers<[1], [1], [0], [0], [0, 0, 1, 0], [], []>} : vector<64x64xbf16>, vector<8x64xbf16>, vector<64x8xf32> -> vector<64x8xf32>
    %36 = vector.shape_cast %35 : vector<64x8xf32> to vector<8x8x8xf32>
    %c0_26 = arith.constant 0 : index
    %c0_27 = arith.constant 0 : index
    %37 = vector.load %arg10[%c0_26, %c0_27] : memref<64x64xbf16, #tpu.memory_space<vmem>>, vector<64x64xbf16>
    %38 = arith.truncf %33 : vector<64x64xf32> to vector<64x64xbf16>
    %cst_28 = arith.constant dense<0.000000e+00> : vector<64x64xf32>
    %39 = tpu.matmul %38, %37, %cst_28 {dimension_numbers = #tpu.dot_dimension_numbers<[1], [1], [0], [0], [0, 0, 1, 0], [], []>} : vector<64x64xbf16>, vector<64x64xbf16>, vector<64x64xf32> -> vector<64x64xf32>
    %40 = vector.shape_cast %39 : vector<64x64xf32> to vector<8x8x64xf32>
    %41 = arith.truncf %40 : vector<8x8x64xf32> to vector<8x8x64xbf16>
    %cst_29 = arith.constant dense<0.000000e+00> : vector<8x8x8xf32>
    %42 = tpu.matmul %41, %7, %cst_29 {dimension_numbers = #tpu.dot_dimension_numbers<[2], [2], [1], [1], [0, 0, 0, 1, 1, 1], [0], [0]>} : vector<8x8x64xbf16>, vector<8x8x64xbf16>, vector<8x8x8xf32> -> vector<8x8x8xf32>
    %43 = arith.addf %36, %42 : vector<8x8x8xf32>
    %cst_30 = arith.constant 0.353553385 : f32
    %44 = vector.broadcast %cst_30 : f32 to vector<8x8x8xf32>
    %45 = arith.mulf %43, %44 : vector<8x8x8xf32>
    %cst_31 = arith.constant 0.000000e+00 : f32
    %46 = vector.broadcast %cst_31 : f32 to vector<1x1x8xf32>
    %47 = arith.cmpf ogt, %8, %46 : vector<1x1x8xf32>
    %cst_32 = arith.constant -9.99999986E+14 : f32
    %48 = vector.shape_cast %47 : vector<1x1x8xi1> to vector<1x1x8xi1>
    %49 = vector.broadcast %48 : vector<1x1x8xi1> to vector<8x8x8xi1>
    %50 = vector.broadcast %cst_32 : f32 to vector<8x8x8xf32>
    %51 = arith.select %49, %45, %50 : vector<8x8x8xi1>, vector<8x8x8xf32>
    %cst_33 = arith.constant dense<0xFF800000> : vector<8x8xf32>
    %52 = vector.multi_reduction <maximumf>, %51, %cst_33 [2] : vector<8x8x8xf32> to vector<8x8xf32>
    %53 = vector.shape_cast %52 : vector<8x8xf32> to vector<8x8x1xf32>
    %54 = vector.broadcast %53 : vector<8x8x1xf32> to vector<8x8x8xf32>
    %55 = arith.subf %51, %54 : vector<8x8x8xf32>
    %56 = math.exp %55 : vector<8x8x8xf32>
    %cst_34 = arith.constant dense<0.000000e+00> : vector<8x8xf32>
    %57 = vector.multi_reduction <add>, %56, %cst_34 [2] : vector<8x8x8xf32> to vector<8x8xf32>
    %58 = vector.shape_cast %57 : vector<8x8xf32> to vector<8x8x1xf32>
    %59 = tpu.reciprocal %58 {approx = true} : vector<8x8x1xf32> -> vector<8x8x1xf32>
    %60 = vector.broadcast %59 : vector<8x8x1xf32> to vector<8x8x8xf32>
    %61 = arith.mulf %56, %60 : vector<8x8x8xf32>
    %62 = vector.shape_cast %61 : vector<8x8x8xf32> to vector<64x8xf32>
    %63 = arith.truncf %62 : vector<64x8xf32> to vector<64x8xbf16>
    %cst_35 = arith.constant dense<0.000000e+00> : vector<64x64xf32>
    %64 = tpu.matmul %63, %5, %cst_35 {dimension_numbers = #tpu.dot_dimension_numbers<[1], [0], [0], [1], [0, 0, 1, 1], [], []>} : vector<64x8xbf16>, vector<8x64xbf16>, vector<64x64xf32> -> vector<64x64xf32>
    %65 = vector.shape_cast %64 : vector<64x64xf32> to vector<8x8x64xf32>
    %66 = vector.shape_cast %9 : vector<8x64xf32> to vector<1x8x64xf32>
    %67 = vector.broadcast %66 : vector<1x8x64xf32> to vector<8x8x64xf32>
    %68 = arith.mulf %65, %67 : vector<8x8x64xf32>
    %cst_36 = arith.constant dense<0.000000e+00> : vector<8x64xf32>
    %69 = vector.multi_reduction <add>, %68, %cst_36 [1] : vector<8x8x64xf32> to vector<8x64xf32>
    %c0_37 = arith.constant 0 : index
    %c0_38 = arith.constant 0 : index
    %70 = vector.load %arg13[%c0_37, %c0_38] : memref<64x64xbf16, #tpu.memory_space<vmem>>, vector<64x64xbf16>
    %71 = arith.truncf %69 : vector<8x64xf32> to vector<8x64xbf16>
    %cst_39 = arith.constant dense<0.000000e+00> : vector<8x64xf32>
    %72 = tpu.matmul %71, %70, %cst_39 {dimension_numbers = #tpu.dot_dimension_numbers<[1], [0], [0], [1], [0, 0, 1, 1], [], []>} : vector<8x64xbf16>, vector<64x64xbf16>, vector<8x64xf32> -> vector<8x64xf32>
    %c0_40 = arith.constant 0 : index
    %c0_41 = arith.constant 0 : index
    %73 = vector.load %arg14[%c0_40, %c0_41] : memref<1x64xf32, #tpu.memory_space<vmem>>, vector<1x64xf32>
    %74 = vector.broadcast %73 : vector<1x64xf32> to vector<8x64xf32>
    %75 = arith.addf %72, %74 : vector<8x64xf32>
    %76 = arith.addf %75, %1 : vector<8x64xf32>
    %cst_42 = arith.constant dense<0.000000e+00> : vector<8xf32>
    %77 = vector.multi_reduction <add>, %76, %cst_42 [1] : vector<8x64xf32> to vector<8xf32>
    %78 = vector.shape_cast %77 : vector<8xf32> to vector<8x1xf32>
    %cst_43 = arith.constant 6.400000e+01 : f32
    %79 = vector.broadcast %cst_43 : f32 to vector<8x1xf32>
    %80 = arith.divf %78, %79 : vector<8x1xf32>
    %81 = vector.broadcast %80 : vector<8x1xf32> to vector<8x64xf32>
    %82 = arith.subf %76, %81 : vector<8x64xf32>
    %83 = arith.mulf %82, %82 : vector<8x64xf32>
    %cst_44 = arith.constant dense<0.000000e+00> : vector<8xf32>
    %84 = vector.multi_reduction <add>, %83, %cst_44 [1] : vector<8x64xf32> to vector<8xf32>
    %85 = vector.shape_cast %84 : vector<8xf32> to vector<8x1xf32>
    %cst_45 = arith.constant 6.400000e+01 : f32
    %86 = vector.broadcast %cst_45 : f32 to vector<8x1xf32>
    %87 = arith.divf %85, %86 : vector<8x1xf32>
    %88 = vector.broadcast %80 : vector<8x1xf32> to vector<8x64xf32>
    %89 = arith.subf %76, %88 : vector<8x64xf32>
    %cst_46 = arith.constant 9.99999996E-13 : f32
    %90 = vector.broadcast %cst_46 : f32 to vector<8x1xf32>
    %91 = arith.addf %87, %90 : vector<8x1xf32>
    %92 = math.rsqrt %91 : vector<8x1xf32>
    %93 = vector.broadcast %92 : vector<8x1xf32> to vector<8x64xf32>
    %94 = arith.mulf %89, %93 : vector<8x64xf32>
    %c0_47 = arith.constant 0 : index
    %c0_48 = arith.constant 0 : index
    %95 = vector.load %arg15[%c0_47, %c0_48] : memref<1x64xf32, #tpu.memory_space<vmem>>, vector<1x64xf32>
    %96 = vector.broadcast %95 : vector<1x64xf32> to vector<8x64xf32>
    %97 = arith.mulf %94, %96 : vector<8x64xf32>
    %c0_49 = arith.constant 0 : index
    %c0_50 = arith.constant 0 : index
    %98 = vector.load %arg16[%c0_49, %c0_50] : memref<1x64xf32, #tpu.memory_space<vmem>>, vector<1x64xf32>
    %99 = vector.broadcast %98 : vector<1x64xf32> to vector<8x64xf32>
    %100 = arith.addf %97, %99 : vector<8x64xf32>
    %c0_51 = arith.constant 0 : index
    %c0_52 = arith.constant 0 : index
    %c0_53 = arith.constant 0 : index
    %101 = vector.load %arg17[%c0_51, %c0_52, %c0_53] : memref<1x8x64xf32, #tpu.memory_space<vmem>>, vector<1x8x64xf32>
    %102 = vector.shape_cast %101 : vector<1x8x64xf32> to vector<8x64xf32>
    %103 = vector.shape_cast %100 : vector<8x64xf32> to vector<1x8x64xf32>
    tpu.vector_store %arg17[%c0_51, %c0_52, %c0_53], %103 {strides = array<i32>} : memref<1x8x64xf32, #tpu.memory_space<vmem>>, vector<1x8x64xf32>,
    return
  }
  func.func @transform_0(%arg0: i32, %arg1: i32) -> (i32, i32, i32) {
    %c0_i32 = arith.constant 0 : i32
    %c0_i32_0 = arith.constant 0 : i32
    %c0_i32_1 = arith.constant 0 : i32
    return %arg0, %c0_i32, %c0_i32_0 : i32, i32, i32
  }
  func.func @transform_1(%arg0: i32, %arg1: i32) -> (i32, i32, i32) {
    %c0_i32 = arith.constant 0 : i32
    %c0_i32_0 = arith.constant 0 : i32
    return %arg0, %arg1, %c0_i32 : i32, i32, i32
  }
  func.func @transform_2(%arg0: i32, %arg1: i32) -> (i32, i32, i32) {
    %c0_i32 = arith.constant 0 : i32
    %c0_i32_0 = arith.constant 0 : i32
    %c0_i32_1 = arith.constant 0 : i32
    return %arg0, %c0_i32, %c0_i32_0 : i32, i32, i32
  }
  func.func @transform_3(%arg0: i32, %arg1: i32) -> (i32, i32, i32, i32) {
    %c0_i32 = arith.constant 0 : i32
    %c0_i32_0 = arith.constant 0 : i32
    %c0_i32_1 = arith.constant 0 : i32
    return %arg0, %arg1, %c0_i32, %c0_i32_0 : i32, i32, i32, i32
  }
  func.func @transform_4(%arg0: i32, %arg1: i32) -> (i32, i32, i32) {
    %c0_i32 = arith.constant 0 : i32
    %c0_i32_0 = arith.constant 0 : i32
    %c0_i32_1 = arith.constant 0 : i32
    return %arg0, %c0_i32, %c0_i32_0 : i32, i32, i32
  }
  func.func @transform_5(%arg0: i32, %arg1: i32) -> (i32, i32) {
    %c0_i32 = arith.constant 0 : i32
    %c0_i32_0 = arith.constant 0 : i32
    %c0_i32_1 = arith.constant 0 : i32
    return %c0_i32, %c0_i32_0 : i32, i32
  }
  func.func @transform_6(%arg0: i32, %arg1: i32) -> (i32, i32) {
    %c0_i32 = arith.constant 0 : i32
    %c0_i32_0 = arith.constant 0 : i32
    %c0_i32_1 = arith.constant 0 : i32
    return %c0_i32, %c0_i32_0 : i32, i32
  }
  func.func @transform_7(%arg0: i32, %arg1: i32) -> (i32, i32) {
    %c0_i32 = arith.constant 0 : i32
    %c0_i32_0 = arith.constant 0 : i32
    %c0_i32_1 = arith.constant 0 : i32
    return %c0_i32, %c0_i32_0 : i32, i32
  }
  func.func @transform_8(%arg0: i32, %arg1: i32) -> (i32, i32) {
    %c0_i32 = arith.constant 0 : i32
    %c0_i32_0 = arith.constant 0 : i32
    %c0_i32_1 = arith.constant 0 : i32
    return %c0_i32, %c0_i32_0 : i32, i32
  }
  func.func @transform_9(%arg0: i32, %arg1: i32) -> (i32, i32) {
    %c0_i32 = arith.constant 0 : i32
    %c0_i32_0 = arith.constant 0 : i32
    %c0_i32_1 = arith.constant 0 : i32
    return %c0_i32, %c0_i32_0 : i32, i32
  }
  func.func @transform_10(%arg0: i32, %arg1: i32) -> (i32, i32) {
    %c0_i32 = arith.constant 0 : i32
    %c0_i32_0 = arith.constant 0 : i32
    %c0_i32_1 = arith.constant 0 : i32
    return %c0_i32, %c0_i32_0 : i32, i32
  }
  func.func @transform_11(%arg0: i32, %arg1: i32) -> (i32, i32) {
    %c0_i32 = arith.constant 0 : i32
    %c0_i32_0 = arith.constant 0 : i32
    %c0_i32_1 = arith.constant 0 : i32
    return %c0_i32, %c0_i32_0 : i32, i32
  }
  func.func @transform_12(%arg0: i32, %arg1: i32) -> (i32, i32) {
    %c0_i32 = arith.constant 0 : i32
    %c0_i32_0 = arith.constant 0 : i32
    %c0_i32_1 = arith.constant 0 : i32
    return %c0_i32, %c0_i32_0 : i32, i32
  }
  func.func @transform_13(%arg0: i32, %arg1: i32) -> (i32, i32) {
    %c0_i32 = arith.constant 0 : i32
    %c0_i32_0 = arith.constant 0 : i32
    %c0_i32_1 = arith.constant 0 : i32
    return %c0_i32, %c0_i32_0 : i32, i32
  }
  func.func @transform_14(%arg0: i32, %arg1: i32) -> (i32, i32) {
    %c0_i32 = arith.constant 0 : i32
    %c0_i32_0 = arith.constant 0 : i32
    %c0_i32_1 = arith.constant 0 : i32
    return %c0_i32, %c0_i32_0 : i32, i32
  }
  func.func @transform_15(%arg0: i32, %arg1: i32) -> (i32, i32, i32) {
    %c0_i32 = arith.constant 0 : i32
    %c0_i32_0 = arith.constant 0 : i32
    return %arg0, %arg1, %c0_i32 : i32, i32, i32
  }
}

</mosaic_0001>

<bundles_post_ra>
// kernel: tpu_custom_call.1
= control target key start
LH: loop header
LB: loop body
LE: loop exit
PB: predicated region body
PF: predicated region fallthrough
CT: control target
= control target key end

     0   :  { %s2836_s0 = inlined_call_operand.hbm [shape: bf16[2,8,64], index: 0, kind: input, shape index: {}]   ;;  %s2837_s1 = inlined_call_operand.hbm [shape: f32[2,8,64], index: 1, kind: input, shape index: {}]   ;;  %s2838_s2 = inlined_call_operand.hbm [shape: bf16[2,8,64], index: 2, kind: input, shape index: {}]   ;;  %s2839_s3 = inlined_call_operand.hbm [shape: bf16[2,8,8,64], index: 3, kind: input, shape index: {}]   ;;  %s2840_s4 = inlined_call_operand.vmem [shape: f32[2,1,8], index: 4, kind: input, shape index: {}]   ;;  %s2841_s5 = inlined_call_operand.hbm [shape: f32[8,64], index: 5, kind: input, shape index: {}]   ;;  %s2842_s6 = inlined_call_operand.hbm [shape: bf16[64,64], index: 6, kind: input, shape index: {}]   ;;  %s2843_s7 = inlined_call_operand.vmem [shape: f32[1,64], index: 7, kind: input, shape index: {}]   ;;  %s2844_s8 = inlined_call_operand.hbm [shape: bf16[64,64], index: 8, kind: input, shape index: {}]   ;;  %s2845_s9 = inlined_call_operand.vmem [shape: f32[1,64], index: 9, kind: input, shape index: {}]   ;;  %s2846_s10 = inlined_call_operand.vmem [shape: f32[1,64], index: 10, kind: input, shape index: {}]   ;;  %s2847_s11 = inlined_call_operand.hbm [shape: bf16[64,64], index: 11, kind: input, shape index: {}]   ;;  %s2848_s12 = inlined_call_operand.vmem [shape: f32[1,64], index: 12, kind: input, shape index: {}]   ;;  %s2849_s13 = inlined_call_operand.vmem [shape: f32[1,64], index: 13, kind: input, shape index: {}]   ;;  %s2850_s14 = inlined_call_operand.vmem [shape: f32[1,64], index: 14, kind: input, shape index: {}]   ;;  %s2851_s15 = inlined_call_operand.hbm [shape: f32[2,8,64], index: 15, kind: output, shape index: {}]  }
   0x1   :  { %2865 = sst [smem:[#allocation31_spill]] %s2836_s0 }
   0x2   :  { %2866 = sst [smem:[#allocation32_spill]] %s2837_s1 }
   0x3   :  { %2867 = sst [smem:[#allocation33_spill]] %s2838_s2 }
   0x4   :  { %2868 = sst [smem:[#allocation34_spill]] %s2840_s4 }
   0x5   :  { %2869 = sst [smem:[#allocation35_spill]] %s2841_s5 }
   0x6   :  { %2870 = sst [smem:[#allocation36_spill]] %s2842_s6 }
   0x7   :  { %2871 = sst [smem:[#allocation37_spill]] %s2844_s8 }
   0x8   :  { %2872 = sst [smem:[#allocation38_spill]] %s2846_s10 }
   0x9   :  { %2873 = sst [smem:[#allocation39_spill]] %s2847_s11 }
   0xa   :  { %2874 = sst [smem:[#allocation40_spill]] %s2848_s12 }
   0xb   :  { %2875 = sst [smem:[#allocation41_spill]] %s2849_s13 }
   0xc   :  { %2876 = sst [smem:[#allocation42_spill]] %s2850_s14 }
   0xd   :  { %2877 = sst [smem:[#allocation43_spill]] %s2851_s15 }
   0xe   :  { %20 = vsyncpa [#allocation3], 0 }
   0xf   :  { %22 = vsyncpa [#allocation3 + $0x1], 0 }
  0x10   :  { %23 = vsyncpa [#allocation6], 0 }
  0x11   :  { %25 = vsyncpa [#allocation6 + $0x1], 0 }
  0x12   :  { %26 = vsyncpa [#allocation9], 0 }
  0x13   :  { %28 = vsyncpa [#allocation9 + $0x1], 0 }
  0x14   :  { %29 = vsyncpa [#allocation12], 0 }
  0x15   :  { %30 = vsyncpa [#allocation15], 0 }
  0x16   :  { %31 = vsyncpa [#allocation4], 0 }
  0x17   :  { %33 = vsyncpa [#allocation4 + $0x1], 0  ;;  %s2449_s18 = smov 0   ;;  %s2451_s19 = smov 0  }
  0x18   :  { %s2453_s20 = smov 0   ;;  %s2455_s21 = smov 0  }
  0x19   :  { %s2457_s22 = smov 0   ;;  %s2459_s23 = smov 0  }
  0x1a LB: > { %2878 = sst [smem:[#allocation24_spill]] %s2339_s18  ;;  %s2480_s24 = sadd.s32 4294967295, %s2359_s23   ;;  %s2359_s23 = sphi %s2459_s23, %s39_s23   ;;  %s2355_s22 = sphi %s2457_s22, %s2922_s22   ;;  %s2351_s21 = sphi %s2455_s21, %s2921_s21   ;;  %s2347_s20 = sphi %s2453_s20, %s2917_s20   ;;  %s2343_s19 = sphi %s2451_s19, %s2920_s19   ;;  %s2339_s18 = sphi %s2449_s18, %s2919_s18  }
  0x1b   : > { %2879 = sst [smem:[#allocation25_spill]] %s2347_s20  ;;  %s1740_s25 = sadd.s32 4294967294, %s2359_s23  }
  0x1c   : > { %2880 = sst [smem:[#allocation26_spill]] %s2351_s21  ;;  %p71_p0 = scmp.ne.s32.totalorder %s2343_s19, %s2339_s18 }
  0x1d   : > { %p72_p1 = scmp.eq.s32.totalorder %s2480_s24, 0  ;;  %p415_p2 = scmp.eq.s32.totalorder %s2480_s24, 1 }
  0x1e   : > { %p421_p3 = scmp.eq.s32.totalorder %s1740_s25, 1  ;;  %p1741_p5 = scmp.ge.s32.totalorder %s2359_s23, 1 }
  0x1f   : > { %p2489_p4 = por %p72_p1, %p71_p0  ;;  %p428_p7 = scmp.lt.s32.totalorder %s2359_s23, 3 }
  0x20   : > { %p2494_p6 = por %p421_p3, %p71_p0  ;;  %s2884_s5 = sld [smem:[#allocation35_spill]] }
  0x21   : > { %p2502_p8 = pnand %p1741_p5, %p428_p7  ;;  %s2361_s17 = smov [#allocation10]  }
  0x22   : > { %s2882_s27 = scalar_select %p2494_p6, 1, 0 }
  0x23   : > { %p1879_p10 = pneg %p2502_p8  ;;  %s442_s25 = sshll.u32 %s2361_s17, 4  ;;  %s443_s25 = int_to_ptr.vmem [resolvable:$true] %s442_s25 }
  0x24   : > { %2883 = sst [smem:[#allocation27_spill]] %s2882_s27  ;;  %s2362_s18 = smov [#allocation11]  }
  0x25   : > { %s2886_s6 = sld [smem:[#allocation36_spill]]  ;;  %p2514_p11 = pnand %p1879_p10, %p72_p1 }
  0x26   : > { %s440_s30 = sshll.u32 %s2884_s5, 4  ;;  %s453_s14 = sshll.u32 %s2362_s18, 4  ;;  %s441_s30 = int_to_ptr.hbm [resolvable:$true] %s440_s30  ;;  %s454_s14 = int_to_ptr.vmem [resolvable:$true] %s453_s14 }
  0x27   : > { %1882 = dma.hbm_to_vmem [thread:$0]  (!%p2514_p11), %s441_s30, 128, %s443_s25, [#allocation9]  }
  0x28   : > { %s2854_s17 = smov 64   ;;  %s2856_s27 = smov 4  }
  0x29   : > { %s51_s28 = sadd.s32 1, %s2355_s22  ;;  %p65_p13 = scmp.ne.s32.totalorder %s2347_s20, %s2343_s19 }
  0x2a   : > { %p53_p12 = scmp.ge.s32.totalorder %s51_s28, 2  ;;  %p66_p0 = scmp.eq.s32.totalorder %s2359_s23, 0 }
  0x2b   : > { %s451_s29 = sshll.u32 %s2886_s6, 4  ;;  %s58_s6 = sadd.s32 1, %s2347_s20  ;;  %s452_s29 = int_to_ptr.hbm [resolvable:$true] %s451_s29 }
  0x2c   : > { %1885 = dma.hbm_to_vmem [thread:$0]  (!%p2514_p11), %s452_s29, 512, %s454_s14, [#allocation12], %s2854_s17, %s2854_s17, %s2856_s27  }
  0x2d   : > { %p1913_p3 = scmp.lt.s32.totalorder %s2359_s23, 2  ;;  %s2924_s28 = smov (%p53_p12, %s51_s28), 0 }
  0x2e   : > { %2888 = sst [smem:[#allocation28_spill]] %s2924_s28  ;;  %p67_p5 = por %p66_p0, %p65_p13 }
  0x2f   : > { %p2535_p7 = por %p415_p2, %p65_p13  ;;  %s55_s30 = ssub.s32 %s2355_s22, %s2924_s28 }
  0x30   : > { %s2542_s14 = sand.u32 1, %s2347_s20   ;;  %p56_p10 = scmp.eq.s32.totalorder %s55_s30, 0 }
  0x31   : > { %s2889_s18 = scalar_select %p2535_p7, 1, 0 }
  0x32   : > { %p2544_p9 = pnand %p1913_p3, %p67_p5  ;;  %s2864_s29 = sand.u32 1, %s2359_s23  }
  0x33   : > { %2890 = sst [smem:[#allocation29_spill]] %s2889_s18  ;;  %s1749_s17 = sshll.u32 %s2542_s14, 3 }
  0x34   : > { %s2551_s27 = scalar_select %p56_p10, %s2347_s20, %s58_s6  }
  0x35   : > { %s1750_s15 = sshll.u32 %s2355_s22, 3  ;;  %s2893_s1 = sld [smem:[#allocation32_spill]] }
  0x36   : > { %2892 = sst [smem:[#allocation30_spill]] %s2551_s27  ;;  %s536_s28 = scalar_lea.vmem [#allocation5], %s1749_s17 }
  0x37   : > { %s545_s4 = sshll.u32 %s536_s28, 4  ;;  %s2559_s30 = scalar_lea.sflag [#allocation6], %s2864_s29  ;;  %s546_s4 = int_to_ptr.vmem [resolvable:$true] %s545_s4 }
  0x38   : > { %s2894_s8 = sld [smem:[#allocation37_spill]]  ;;  %s2365_s13 = smov [#allocation13]  }
  0x39   : > { %s2895_s11 = sld [smem:[#allocation39_spill]]  ;;  %s2896_s29 = smov 4  }
  0x3a   : > { %s1747_s20 = sshll.u32 %s2542_s14, 2  ;;  %s1748_s27 = sshll.u32 %s2355_s22, 2 }
  0x3b   : > { %s541_s18 = scalar_lea.hbm %s2893_s1, %s1750_s15  ;;  %s470_s15 = sshll.u32 %s2365_s13, 4  ;;  %s471_s15 = int_to_ptr.vmem [resolvable:$true] %s470_s15 }
  0x3c   : > { %s543_s21 = sshll.u32 %s541_s18, 4  ;;  %s2897_s1 = smov 64   ;;  %s544_s21 = int_to_ptr.hbm [resolvable:$true] %s543_s21 }
  0x3d   : > { %1898 = dma.hbm_to_vmem [thread:$0]  (!%p2544_p9), %s544_s21, 128, %s546_s4, %s2559_s30  }
  0x3e   : > { %s468_s12 = sshll.u32 %s2894_s8, 4  ;;  %s2366_s4 = smov [#allocation14]   ;;  %s469_s12 = int_to_ptr.hbm [resolvable:$true] %s468_s12 }
  0x3f   : > { %s488_s18 = sshll.u32 %s2895_s11, 4  ;;  %s490_s21 = sshll.u32 %s2366_s4, 4  ;;  %s489_s18 = int_to_ptr.hbm [resolvable:$true] %s488_s18  ;;  %s491_s21 = int_to_ptr.vmem [resolvable:$true] %s490_s21 }
  0x40   : > { %1888 = dma.hbm_to_vmem [thread:$0]  (!%p2514_p11), %s469_s12, 512, %s471_s15, [#allocation12], %s2897_s1, %s2897_s1, %s2896_s29  }
  0x41   : > { %1891 = dma.hbm_to_vmem [thread:$0]  (!%p2514_p11), %s489_s18, 512, %s491_s21, [#allocation15], %s2897_s1, %s2897_s1, %s2896_s29  }
  0x42   : > { %s517_s13 = scalar_lea.vmem [#allocation2], %s1747_s20  ;;  %s2898_s0 = sld [smem:[#allocation31_spill]] }
  0x43   : > { %s525_s17 = sshll.u32 %s517_s13, 4  ;;  %s2899_s2 = sld [smem:[#allocation33_spill]]  ;;  %s526_s17 = int_to_ptr.vmem [resolvable:$true] %s525_s17 }
  0x44   : > { %s514_s18 = scalar_lea.sflag [#allocation3], %s2542_s14  ;;  %s556_s11 = scalar_lea.vmem [#allocation7], %s1747_s20 }
  0x45   : > { %s564_s13 = sshll.u32 %s556_s11, 4  ;;  %s1840_s6 = sshll.u32 %s2355_s22, 5  ;;  %s565_s13 = int_to_ptr.vmem [resolvable:$true] %s564_s13 }
  0x46   : > { %s2900_s10 = sshll.u32 %s2542_s14, 5 }
  0x47   : > { %s575_s4 = scalar_lea.vmem [#allocation8], %s2900_s10 }
  0x48   : > { %s521_s12 = scalar_lea.hbm %s2898_s0, %s1748_s27  ;;  %s582_s0 = scalar_lea.hbm %s2839_s3, %s1840_s6 }
  0x49   : > { %s523_s15 = sshll.u32 %s521_s12, 4  ;;  %s560_s8 = scalar_lea.hbm %s2899_s2, %s1748_s27  ;;  %s524_s15 = int_to_ptr.hbm [resolvable:$true] %s523_s15 }
  0x4a   : > { %1895 = dma.hbm_to_vmem [thread:$0]  (!%p2544_p9), %s524_s15, 64, %s526_s17, %s514_s18  }
  0x4b   : > { %s562_s21 = sshll.u32 %s560_s8, 4  ;;  %s585_s27 = sshll.u32 %s575_s4, 4  ;;  %s563_s21 = int_to_ptr.hbm [resolvable:$true] %s562_s21  ;;  %s586_s27 = int_to_ptr.vmem [resolvable:$true] %s585_s27 }
  0x4c   : > { %1901 = dma.hbm_to_vmem [thread:$0]  (!%p2544_p9), %s563_s21, 64, %s565_s13, %s2559_s30  }
  0x4d   : > { %s583_s5 = sshll.u32 %s582_s0, 4  ;;  %s2901_s2 = sand.u32 1, %s2359_s23   ;;  %s584_s5 = int_to_ptr.hbm [resolvable:$true] %s583_s5 }
  0x4e   : > { %s572_s17 = scalar_lea.sflag [#allocation9], %s2901_s2  ;;  %603 = sbr.rel (%p2502_p8) target bundleno = 1398 (0x576), region = 80 }
  0x4f   : > { %1904 = dma.hbm_to_vmem [thread:$0]  (!%p2544_p9), %s584_s5, 512, %s586_s27, %s572_s17, %s2897_s1, %s2897_s1, %s2896_s29  }
  0x50   : > { %s2611_s8 = sand.u32 (!%p2502_p8), 1, %s2343_s19  }
  0x51   : > { %s1757_s10 = sshll.u32 (!%p2502_p8), %s2611_s8, 2  ;;  %s606_s0 = scalar_lea.sflag (!%p2502_p8), [#allocation3], %s2611_s8 }
  0x52   : > { %s2615_s11 = scalar_lea.vmem (!%p2502_p8), [#allocation2], %s1757_s10 }
  0x53   : > { %2310 = dma.done.wait (%p2489_p4), %s606_s0, 64  }
  0x54   : > { %2312 = vsyncadd (%p2489_p4), %s606_s0, 4294967232  ;;  %s615_s1 = sand.u32 1, %s2480_s24   ;;  %s1758_s2 = sshll.u32 %s2611_s8, 3 }
  0x55   : > { %s616_s16 = scalar_lea.sflag [#allocation6], %s615_s1  ;;  %s619_s14 = scalar_lea.vmem [#allocation5], %s1758_s2 }
  0x56   : > { %2314 = dma.done.wait (%p2489_p4), %s616_s16, 192  }
  0x57   : > { %2316 = vsyncadd (%p2489_p4), %s616_s16, 4294967104  ;;  %s1760_s25 = sshll.u32 %s2611_s8, 5  ;;  %s2630_s29 = scalar_lea.vmem [#allocation7], %s1757_s10 }
  0x58   : > { %s636_s30 = scalar_lea.sflag [#allocation9], %s615_s1  ;;  %s2632_s20 = scalar_lea.vmem [#allocation8], %s1760_s25 }
  0x59   : > { %2318 = dma.done.wait (%p2489_p4), %s636_s30, 512  }
  0x5a   : > { %2320 = vsyncadd (%p2489_p4), %s636_s30, 4294966784 }
  0x5b   : > { %2322 = dma.done.wait (%p72_p1), [#allocation9], 128  }
  0x5c   : > { %2324 = vsyncadd (%p72_p1), [#allocation9], 4294967168 }
  0x5d   : > { %2326 = dma.done.wait (%p72_p1), [#allocation12], 1024  }
  0x5e   : > { %2328 = vsyncadd (%p72_p1), [#allocation12], 4294966272 }
  0x5f   : > { %2330 = dma.done.wait (%p72_p1), [#allocation15], 512  }
  0x60   : > { %2332 = vsyncadd (%p72_p1), [#allocation15], 4294966784  ;;  %v1844_v0 = vld [vmem:[#allocation11 + $0x18] sm:$0xff]  ;;  %v1843_v2 = vld [vmem:[#allocation11 + $0x10] sm:$0xff]  ;;  %vm780_vm0 = vcmask 523264   ;;  %s2902_s6 = sld [smem:[#allocation38_spill]] }
  0x61   : > { %v1848_v1 = vld [vmem:[#allocation13 + $0x18] sm:$0xff]  ;;  %788 = vmatpush.bf16.msra.mxu0 %v1844_v0  ;;  %v1847_v4 = vld [vmem:[#allocation13 + $0x10] sm:$0xff]  ;;  %v1842_v5 = vld [vmem:[#allocation11 + $0x8] sm:$0xff]  ;;  %s2903_s28 = sld [smem:[#allocation26_spill]]  ;;  %vm1192_vm3 = vcmask 64512   ;;  %vm1297_vm4 = vcmask 1043456  }
  0x62   : > { %v973_v3 = vsel %vm780_vm0, %v1848_v1, 0  ;;  %v970_v6 = vsel %vm780_vm0, %v1847_v4, 0  ;;  %v1841_v7 = vld [vmem:[#allocation11] sm:$0xff]  ;;  %v1846_v10 = vld [vmem:[#allocation13 + $0x8] sm:$0xff]  ;;  %v731_v12 = vld [vmem:[%s2615_s11] sm:$0xf] }
  0x63   : > { %979 = vmatpush.bf16.xpose.msra.mxu2 %v973_v3  ;;  %v2652_v8 = vld [vmem:[%s619_s14] sm:$0xff]  ;;  %v967_v11 = vsel %vm780_vm0, %v1846_v10, 0  ;;  %v888_v14 = vsel %vm780_vm0, %v731_v12, 0  ;;  %v1975_v16 = vld [vmem:[%s2843_s7] ss:$0 sm:$0xff]  ;;  %s2904_s5 = sld [smem:[#allocation34_spill]] }
  0x64   : > { %v751_v9 = vpack.c.bf16 %v2652_v8, %v2652_v8  ;;  %v1845_v13 = vld [vmem:[#allocation13] sm:$0xff]  ;;  %897 = vmatpush.bf16.xpose.msra.mxu1 %v888_v14  ;;  %v1976_v17 = vld [vmem:[%s2845_s9] ss:$0 sm:$0xff]  ;;  %vm1430_vm5 = vcmask 1041409   ;;  %vm1432_vm6 = vcmask 1042434   ;;  %vm1434_vm7 = vcmask 1043459  }
  0x65   : > { %789 = vmatpush.bf16.msra.mxu0 %v1843_v2  ;;  %v964_v15 = vsel %vm780_vm0, %v1845_v13, 0  ;;  %v2670_v27 = vld [vmem:[#allocation10] sm:$0xff]  ;;  %vm1436_vm8 = vcmask 1044484   ;;  %vm1438_vm9 = vcmask 1045509   ;;  %vm1440_vm10 = vcmask 1046534   ;;  %s2907_s11 = sld [smem:[#allocation40_spill]] }
  0x66   : > { %v1977_v18 = vld [vmem:[%s2902_s6] ss:$0 sm:$0xff]  ;;  %vm1442_vm11 = vcmask 1047559   ;;  %s2908_s25 = sld [smem:[#allocation41_spill]]  ;;  %s724_s6 = scalar_lea.vmem [#allocation16], %s1758_s2 }
  0x67   : > { %v733_v51 = vld [vmem:[%s2632_s20] sm:$0xf]  ;;  %p726_p1 = scmp.lt.s32.totalorder %s2903_s28, 1  ;;  %s1837_s1 = sshll.u32 %s2903_s28, 3 }
  0x68   : > { %v1016_v52 = vsel %vm780_vm0, %v733_v51, 0  ;;  %s2912_s13 = sld [smem:[#allocation42_spill]]  ;;  %s1527_s4 = scalar_lea.sflag [#allocation4], %s2611_s8 }
  0x69   : > { %790 = vmatpush.bf16.msra.mxu0 %v1842_v5  ;;  %s727_s12 = scalar_select %p726_p1, %s2903_s28, 1 }
  0x6a   : > { %s1540_s28 = sshll.u32 %s724_s6, 4  ;;  %s1541_s28 = int_to_ptr.vmem [resolvable:$true] %s1540_s28 }
  0x6b   : > { %980 = vmatpush.bf16.xpose.msra.mxu2 %v970_v6  ;;  %s728_s17 = scalar_lea.vmem %s2904_s5, %s727_s12 }
  0x6c   : > { %1025 = vmatpush.bf16.xpose.msrb.mxu1 %v1016_v52 }
  0x6d   : > { %791 = vmatpush.bf16.msra.mxu0 %v1841_v7 }
  0x70   : > { %1782 = vmatmul.msk.bf16.vlgmr.msra.gmra.mxu0 %vm780_vm0, %v751_v9 }
  0x73   : > { %981 = vmatpush.bf16.xpose.msra.mxu2 %v967_v11 }
  0x7b   : > { %982 = vmatpush.bf16.xpose.msra.mxu2 %v964_v15 }
  0xed   : > { %v793_v19 = vpop.f32.mrf.mxu0 }
  0xee   : > { %v794_v20 = vadd.f32 %v1975_v16, %v793_v19 }
  0xf0   : > { %v801_v21 = vadd.f32 %v1976_v17, %v794_v20  ;;  %v806_v22 = vadd.f32 %v1977_v18, %v794_v20  ;;  %v734_v18 = vld [vmem:[%s2632_s20 + $0x4] sm:$0xf]  ;;  %v735_v20 = vld [vmem:[%s2632_s20 + $0x8] sm:$0xf] }
  0xf1   : > { %v1035_v19 = vsel %vm780_vm0, %v734_v18, 0 }
  0xf2   : > { %v808_v23 = vrot.slane %v801_v21, 1  ;;  %v815_v24 = vperm.slane %v801_v21, 0  ;;  %v840_v25 = vrot.slane %v806_v22, 1  ;;  %v847_v26 = vperm.slane %v806_v22, 0  ;;  %1044 = vmatpush.bf16.xpose.msrb.mxu0 %v1035_v19 }
  0xf3   : > { %v809_v37 = vrot.slane %v801_v21, 2  ;;  %v810_v38 = vrot.slane %v801_v21, 3  ;;  %v841_v39 = vrot.slane %v806_v22, 2  ;;  %v842_v40 = vrot.slane %v806_v22, 3 }
  0xf4   : > { %v816_v28 = vperm.slane %v808_v23, 0  ;;  %v848_v29 = vperm.slane %v840_v25, 0  ;;  %v831_v31 = vmul.f32 %v815_v24, %v2670_v27  ;;  %v863_v33 = vmul.f32 %v847_v26, %v2670_v27  ;;  %v738_v24 = vld [vmem:[%s2632_s20 + $0x14] sm:$0xf] }
  0xf5   : > { %v795_v30 = vpop.f32.mrf.mxu0  ;;  %v817_v41 = vperm.slane %v809_v37, 0  ;;  %v818_v42 = vperm.slane %v810_v38, 0  ;;  %v849_v43 = vperm.slane %v841_v39, 0  ;;  %v850_v44 = vperm.slane %v842_v40, 0 }
  0xf6   : > { %v832_v32 = vmul.f32 %v816_v28, %v2670_v27  ;;  %v864_v34 = vmul.f32 %v848_v29, %v2670_v27  ;;  %v811_v53 = vrot.slane %v801_v21, 4  ;;  %v812_v54 = vrot.slane %v801_v21, 5  ;;  %v737_v29 = vld [vmem:[%s2632_s20 + $0x10] sm:$0xf] }
  0xf7   : > { %v833_v45 = vmul.f32 %v817_v41, %v2670_v27  ;;  %v834_v46 = vmul.f32 %v818_v42, %v2670_v27  ;;  %v865_v47 = vmul.f32 %v849_v43, %v2670_v27  ;;  %v866_v48 = vmul.f32 %v850_v44, %v2670_v27 }
  0xf8   : > { %v871_v35 = vpack.c.bf16 %v832_v32, %v831_v31  ;;  %v927_v36 = vpack.c.bf16 %v864_v34, %v863_v33  ;;  %v843_v55 = vrot.slane %v806_v22, 4  ;;  %v844_v56 = vrot.slane %v806_v22, 5  ;;  %v740_v34 = vld [vmem:[%s2632_s20 + $0x1c] sm:$0xf] }
  0xf9   : > { %v872_v49 = vpack.c.bf16 %v834_v46, %v833_v45  ;;  %v928_v50 = vpack.c.bf16 %v866_v48, %v865_v47  ;;  %v819_v57 = vperm.slane %v811_v53, 0  ;;  %v820_v58 = vperm.slane %v812_v54, 0 }
  0xfa   : > { %1783 = vmatmul.msk.bf16.vlgmr.msra.gmra.mxu1 %vm780_vm0, %v871_v35  ;;  %1803 = vmatmul.msk.bf16.vlgmr.msra.gmra.mxu2 %vm780_vm0, %v927_v36  ;;  %v851_v59 = vperm.slane %v843_v55, 0  ;;  %v852_v60 = vperm.slane %v844_v56, 0  ;;  %v813_v3 = vrot.slane %v801_v21, 6  ;;  %v814_v4 = vrot.slane %v801_v21, 7  ;;  %v739_v36 = vld [vmem:[%s2632_s20 + $0x18] sm:$0xf] }
  0xfb   : > { %v835_v61 = vmul.f32 %v819_v57, %v2670_v27  ;;  %v836_v62 = vmul.f32 %v820_v58, %v2670_v27  ;;  %v845_v5 = vrot.slane %v806_v22, 6  ;;  %v846_v6 = vrot.slane %v806_v22, 7  ;;  %v736_v22 = vld [vmem:[%s2632_s20 + $0xc] sm:$0xf]  ;;  %v741_v56 = vld [vmem:[%s728_s17] sm:$0x1] }
  0xfc   : > { %v867_v63 = vmul.f32 %v851_v59, %v2670_v27  ;;  %v868_v0 = vmul.f32 %v852_v60, %v2670_v27  ;;  %v821_v7 = vperm.slane %v813_v3, 0  ;;  %v822_v9 = vperm.slane %v814_v4, 0  ;;  %s2909_s20 = sld [smem:[#allocation43_spill]] }
  0xfd   : > { %v873_v1 = vpack.c.bf16 %v836_v62, %v835_v61  ;;  %v853_v10 = vperm.slane %v845_v5, 0  ;;  %v854_v11 = vperm.slane %v846_v6, 0  ;;  %v1054_v21 = vsel %vm780_vm0, %v735_v20, 0 }
  0xfe   : > { %v929_v2 = vpack.c.bf16 %v868_v0, %v867_v63  ;;  %v837_v12 = vmul.f32 %v821_v7, %v2670_v27  ;;  %v838_v13 = vmul.f32 %v822_v9, %v2670_v27  ;;  %1063 = vmatpush.bf16.xpose.msra.mxu0 %v1054_v21  ;;  %v1073_v23 = vsel %vm780_vm0, %v736_v22, 0 }
  0xff   : > { %v869_v14 = vmul.f32 %v853_v10, %v2670_v27  ;;  %v870_v15 = vmul.f32 %v854_v11, %v2670_v27  ;;  %1082 = vmatpush.bf16.xpose.msra.mxu3 %v1073_v23  ;;  %v1111_v25 = vsel %vm780_vm0, %v738_v24, 0  ;;  %v1092_v32 = vsel %vm780_vm0, %v737_v29, 0 }
 0x100   : > { %v874_v16 = vpack.c.bf16 %v838_v13, %v837_v12  ;;  %v1149_v35 = vsel %vm780_vm0, %v740_v34, 0  ;;  %v1130_v40 = vsel %vm780_vm0, %v739_v36, 0  ;;  %vm1180_vm1 = vcmp.gt.f32.partialorder %v741_v56, 0.0 }
 0x101   : > { %v930_v17 = vpack.c.bf16 %v870_v15, %v869_v14  ;;  %1158 = vmatpush.bf16.xpose.msra.mxu1 %v1149_v35  ;;  %v2367_v58 = vmov 0  }
 0x102   : > { %v1181_v59 = vsel %vm1180_vm1, 1, %v2367_v58  ;;  %s2910_s24 = smov %s2909_s20  ;;  %s1538_s26 = scalar_lea.hbm %s2909_s20, %s1837_s1 }
 0x103   : > { %v1182_v60 = vperm.slane %v1181_v59, 0  ;;  %s1542_s12 = sshll.u32 %s1538_s26, 4  ;;  %s2277_s2 = scalar_lea.hbm %s2910_s24, 16  ;;  %s1543_s12 = int_to_ptr.hbm [resolvable:$true] %s1542_s12 }
 0x104   : > { %s2271_s27 = sshra.s32 %s1543_s12, 4  ;;  %s2272_s27 = int_to_ptr.hbm [resolvable:$true] %s2271_s27 }
 0x105   : > { %vm2725_vm2 = vcmp.eq.s32.totalorder %v1182_v60, 1  ;;  %s2273_s5 = scalar_lea.hbm %s2272_s27, 8  ;;  %p2278_p9 = scmp.lt.s32.totalorder %s2272_s27, %s2910_s24 }
 0x106   : > { %p2274_p2 = scmp.ne.s32.totalorder %s2272_s27, %s2273_s5  ;;  %p2279_p11 = scmp.lt.s32.totalorder %s2277_s2, %s2273_s5 }
 0x107   : > { %1120 = vmatpush.bf16.xpose.msrb.mxu3 %v1111_v25 }
 0x108   : > { %p2275_p4 = pnand %p2274_p2, %p2535_p7  ;;  %p2280_p12 = por %p2279_p11, %p2278_p9 }
 0x10a   : > { %1784 = vmatmul.msk.bf16.gmra.mxu1 %vm780_vm0, %v872_v49  ;;  %1804 = vmatmul.msk.bf16.gmra.mxu2 %vm780_vm0, %v928_v50  ;;  %p2276_p8 = pneg %p2275_p4 }
 0x10c   : > { %p2281_p13 = pnand %p2280_p12, %p2276_p8 }
 0x11a   : > { %1785 = vmatmul.msk.bf16.gmra.mxu1 %vm780_vm0, %v873_v1  ;;  %1805 = vmatmul.msk.bf16.gmra.mxu2 %vm780_vm0, %v929_v2 }
 0x12a   : > { %1786 = vmatmul.msk.bf16.gmra.mxu1 %vm780_vm0, %v874_v16  ;;  %1806 = vmatmul.msk.bf16.gmra.mxu2 %vm780_vm0, %v930_v17 }
 0x177   : > { %v899_v46 = vpop.f32.mrf.mxu1 }
 0x17d   : > { %v984_v26 = vpop.f32.mrf.mxu2 }
 0x17e   : > { %v1004_v28 = vpack.c.bf16 %v984_v26, %v984_v26 }
 0x17f   : > { %v901_v50 = vpop.f32.mrf.mxu1 }
 0x180   : > { %1807 = vmatmul.msk.bf16.vlgmr.msrb.gmra.mxu1 %vm780_vm0, %v1004_v28 }
 0x185   : > { %v986_v30 = vpop.f32.mrf.mxu2 }
 0x186   : > { %v1005_v31 = vpack.c.bf16 %v986_v30, %v986_v30 }
 0x187   : > { %v904_v51 = vpop.f32.mrf.mxu1 }
 0x188   : > { %1808 = vmatmul.msk.bf16.vlgmr.msrb.gmra.mxu0 %vm780_vm0, %v1005_v31 }
 0x189   : > { %1101 = vmatpush.bf16.xpose.msrb.mxu0 %v1092_v32 }
 0x18d   : > { %v989_v33 = vpop.f32.mrf.mxu2 }
 0x18e   : > { %v1006_v38 = vpack.c.bf16 %v989_v33, %v989_v33 }
 0x18f   : > { %v906_v52 = vpop.f32.mrf.mxu1 }
 0x195   : > { %v991_v37 = vpop.f32.mrf.mxu2 }
 0x196   : > { %v1007_v39 = vpack.c.bf16 %v991_v37, %v991_v37 }
 0x197   : > { %v909_v53 = vpop.f32.mrf.mxu1 }
 0x198   : > { %1809 = vmatmul.msk.bf16.vlgmr.msra.gmra.mxu0 %vm780_vm0, %v1006_v38  ;;  %1810 = vmatmul.msk.bf16.vlgmr.msra.gmra.mxu3 %vm780_vm0, %v1007_v39 }
 0x199   : > { %1139 = vmatpush.bf16.xpose.msra.mxu0 %v1130_v40 }
 0x19d   : > { %v994_v41 = vpop.f32.mrf.mxu2 }
 0x19e   : > { %v1008_v43 = vpack.c.bf16 %v994_v41, %v994_v41 }
 0x19f   : > { %v911_v54 = vpop.f32.mrf.mxu1 }
 0x1a5   : > { %v996_v42 = vpop.f32.mrf.mxu2 }
 0x1a6   : > { %v1009_v44 = vpack.c.bf16 %v996_v42, %v996_v42 }
 0x1a7   : > { %v914_v55 = vpop.f32.mrf.mxu1 }
 0x1a8   : > { %1811 = vmatmul.msk.bf16.vlgmr.msrb.gmra.mxu0 %vm780_vm0, %v1008_v43  ;;  %1812 = vmatmul.msk.bf16.vlgmr.msrb.gmra.mxu3 %vm780_vm0, %v1009_v44 }
 0x1ad   : > { %v999_v45 = vpop.f32.mrf.mxu2 }
 0x1ae   : > { %v1010_v48 = vpack.c.bf16 %v999_v45, %v999_v45 }
 0x1af   : > { %v916_v57 = vpop.f32.mrf.mxu1 }
 0x1b5   : > { %v1001_v47 = vpop.f32.mrf.mxu2 }
 0x1b6   : > { %v1011_v49 = vpack.c.bf16 %v1001_v47, %v1001_v47 }
 0x1b8   : > { %1813 = vmatmul.msk.bf16.vlgmr.msra.gmra.mxu0 %vm780_vm0, %v1010_v48  ;;  %1814 = vmatmul.msk.bf16.vlgmr.msra.gmra.mxu1 %vm780_vm0, %v1011_v49 }
 0x1fd   : > { %v1027_v61 = vpop.f32.mrf.mxu1 }
 0x1fe   : > { %v1164_v62 = vadd.f32 %v1027_v61, %v899_v46 }
 0x200   : > { %v1172_v0 = vmul.f32 0.35355338, %v1164_v62 }
 0x202   : > { %v1184_v1 = vsel %vm2725_vm2, %v1172_v0, -1e+15 }
 0x203   : > { %v1193_v2 = vsel %vm1192_vm3, %v1184_v1, -inf }
 0x204   : > { %1194 = vmax.xlane.f32.xlu0 %v1193_v2 }
 0x205   : > { %v1029_v3 = vpop.f32.mrf.mxu1  ;;  %v1046_v4 = vpop.f32.mrf.mxu0 }
 0x206   : > { %v1165_v5 = vadd.f32 %v1046_v4, %v901_v50 }
 0x208   : > { %v1173_v6 = vmul.f32 0.35355338, %v1165_v5 }
 0x20a   : > { %v1185_v7 = vsel %vm2725_vm2, %v1173_v6, -1e+15 }
 0x20b   : > { %v1196_v9 = vsel %vm1192_vm3, %v1185_v7, -inf }
 0x20c   : > { %1197 = vmax.xlane.f32.xlu0 %v1196_v9 }
 0x20d   : > { %v1048_v10 = vpop.f32.mrf.mxu0 }
 0x215   : > { %v1065_v11 = vpop.f32.mrf.mxu0 }
 0x216   : > { %v1166_v12 = vadd.f32 %v1065_v11, %v904_v51 }
 0x218   : > { %v1174_v13 = vmul.f32 0.35355338, %v1166_v12 }
 0x21a   : > { %v1186_v14 = vsel %vm2725_vm2, %v1174_v13, -1e+15 }
 0x21b   : > { %v1084_v15 = vpop.f32.mrf.mxu3  ;;  %v1199_v16 = vsel %vm1192_vm3, %v1186_v14, -inf }
 0x21c   : > { %v1167_v17 = vadd.f32 %v1084_v15, %v906_v52  ;;  %1200 = vmax.xlane.f32.xlu1 %v1199_v16 }
 0x21d   : > { %v1067_v18 = vpop.f32.mrf.mxu0 }
 0x21e   : > { %v1175_v19 = vmul.f32 0.35355338, %v1167_v17 }
 0x220   : > { %v1187_v20 = vsel %vm2725_vm2, %v1175_v19, -1e+15 }
 0x221   : > { %v1202_v22 = vsel %vm1192_vm3, %v1187_v20, -inf }
 0x223   : > { %v1086_v21 = vpop.f32.mrf.mxu3 }
 0x224   : > { %1203 = vmax.xlane.f32.xlu1 %v1202_v22 }
 0x225   : > { %v1103_v23 = vpop.f32.mrf.mxu0 }
 0x226   : > { %v1168_v24 = vadd.f32 %v1103_v23, %v909_v53 }
 0x228   : > { %v1176_v25 = vmul.f32 0.35355338, %v1168_v24 }
 0x22a   : > { %v1188_v26 = vsel %vm2725_vm2, %v1176_v25, -1e+15  ;;  %v732_v25 = vld [vmem:[%s2630_s29] sm:$0xf] }
 0x22b   : > { %v1122_v28 = vpop.f32.mrf.mxu3  ;;  %v1205_v29 = vsel %vm1192_vm3, %v1188_v26, -inf }
 0x22c   : > { %v1169_v30 = vadd.f32 %v1122_v28, %v911_v54  ;;  %1206 = vmax.xlane.f32.xlu2 %v1205_v29 }
 0x22d   : > { %v1105_v31 = vpop.f32.mrf.mxu0 }
 0x22e   : > { %v1177_v32 = vmul.f32 0.35355338, %v1169_v30 }
 0x230   : > { %v1189_v33 = vsel %vm2725_vm2, %v1177_v32, -1e+15 }
 0x231   : > { %v1208_v35 = vsel %vm1192_vm3, %v1189_v33, -inf }
 0x233   : > { %v1124_v34 = vpop.f32.mrf.mxu3 }
 0x234   : > { %1209 = vmax.xlane.f32.xlu2 %v1208_v35 }
 0x235   : > { %v1141_v36 = vpop.f32.mrf.mxu0  ;;  %v1160_v37 = vpop.f32.mrf.mxu1 }
 0x236   : > { %v1170_v38 = vadd.f32 %v1141_v36, %v914_v55  ;;  %v1171_v39 = vadd.f32 %v1160_v37, %v916_v57 }
 0x238   : > { %v1178_v40 = vmul.f32 0.35355338, %v1170_v38  ;;  %v1179_v41 = vmul.f32 0.35355338, %v1171_v39 }
 0x23a   : > { %v1190_v42 = vsel %vm2725_vm2, %v1178_v40, -1e+15  ;;  %v1191_v43 = vsel %vm2725_vm2, %v1179_v41, -1e+15 }
 0x23b   : > { %v1211_v44 = vsel %vm1192_vm3, %v1190_v42, -inf  ;;  %v1214_v45 = vsel %vm1192_vm3, %v1191_v43, -inf }
 0x23c   : > { %1212 = vmax.xlane.f32.xlu0 %v1211_v44  ;;  %1215 = vmax.xlane.f32.xlu1 %v1214_v45 }
 0x23d   : > { %v1143_v46 = vpop.f32.mrf.mxu0  ;;  %v1162_v47 = vpop.f32.mrf.mxu1 }
 0x277   : > { %v1195_v48 = vpop.xlane.xlu0 %1194 }
 0x278   : > { %v1217_v49 = vsub.f32 %v1184_v1, %v1195_v48 }
 0x27a   : > { %v1225_v50 = vmul.f32 1.442695, %v1217_v49 }
 0x27c   : > { %1981 = vpow2.f32 %v1225_v50 }
 0x27f   : > { %v1198_v51 = vpop.xlane.xlu0 %1197 }
 0x280   : > { %v1218_v52 = vsub.f32 %v1185_v7, %v1198_v51 }
 0x282   : > { %v1982_v53 = vpop.eup %1981  ;;  %v1227_v54 = vmul.f32 1.442695, %v1218_v52 }
 0x283   : > { %v1241_v55 = vsel %vm1192_vm3, %v1982_v53, 0.0 }
 0x284   : > { %1983 = vpow2.f32 %v1227_v54  ;;  %1242 = vadd.xlane.f32.xlu2 %v1241_v55 }
 0x28a   : > { %v1984_v56 = vpop.eup %1983 }
 0x28b   : > { %v1244_v57 = vsel %vm1192_vm3, %v1984_v56, 0.0 }
 0x28c   : > { %1245 = vadd.xlane.f32.xlu0 %v1244_v57 }
 0x28f   : > { %v1201_v58 = vpop.xlane.xlu1 %1200 }
 0x290   : > { %v1219_v59 = vsub.f32 %v1186_v14, %v1201_v58 }
 0x292   : > { %v1229_v60 = vmul.f32 1.442695, %v1219_v59 }
 0x294   : > { %1985 = vpow2.f32 %v1229_v60 }
 0x297   : > { %v1204_v61 = vpop.xlane.xlu1 %1203 }
 0x298   : > { %v1220_v62 = vsub.f32 %v1187_v20, %v1204_v61 }
 0x29a   : > { %v1986_v63 = vpop.eup %1985  ;;  %v1231_v0 = vmul.f32 1.442695, %v1220_v62 }
 0x29b   : > { %v1247_v1 = vsel %vm1192_vm3, %v1986_v63, 0.0 }
 0x29c   : > { %1987 = vpow2.f32 %v1231_v0  ;;  %1248 = vadd.xlane.f32.xlu1 %v1247_v1 }
 0x29f   : > { %v1207_v2 = vpop.xlane.xlu2 %1206 }
 0x2a0   : > { %v1221_v3 = vsub.f32 %v1188_v26, %v1207_v2  ;;  %v1299_v26 = vsel %vm1297_vm4, %v732_v25, 0 }
 0x2a1   : > { %1308 = vmatpush.bf16.msra.mxu3 %v1299_v26 }
 0x2a2   : > { %v1988_v4 = vpop.eup %1987  ;;  %v1233_v5 = vmul.f32 1.442695, %v1221_v3 }
 0x2a3   : > { %v1250_v6 = vsel %vm1192_vm3, %v1988_v4, 0.0 }
 0x2a4   : > { %1989 = vpow2.f32 %v1233_v5  ;;  %1251 = vadd.xlane.f32.xlu2 %v1250_v6 }
 0x2a7   : > { %v1210_v7 = vpop.xlane.xlu2 %1209 }
 0x2a8   : > { %v1222_v9 = vsub.f32 %v1189_v33, %v1210_v7 }
 0x2aa   : > { %v1990_v10 = vpop.eup %1989  ;;  %v1235_v11 = vmul.f32 1.442695, %v1222_v9 }
 0x2ab   : > { %v1253_v12 = vsel %vm1192_vm3, %v1990_v10, 0.0 }
 0x2ac   : > { %1991 = vpow2.f32 %v1235_v11  ;;  %1254 = vadd.xlane.f32.xlu0 %v1253_v12 }
 0x2af   : > { %v1213_v13 = vpop.xlane.xlu0 %1212  ;;  %v1216_v14 = vpop.xlane.xlu1 %1215 }
 0x2b0   : > { %v1223_v15 = vsub.f32 %v1190_v42, %v1213_v13  ;;  %v1224_v16 = vsub.f32 %v1191_v43, %v1216_v14 }
 0x2b2   : > { %v1992_v17 = vpop.eup %1991  ;;  %v1237_v18 = vmul.f32 1.442695, %v1223_v15  ;;  %v1239_v19 = vmul.f32 1.442695, %v1224_v16 }
 0x2b3   : > { %v1256_v20 = vsel %vm1192_vm3, %v1992_v17, 0.0 }
 0x2b4   : > { %1993 = vpow2.f32 %v1237_v18  ;;  %1257 = vadd.xlane.f32.xlu1 %v1256_v20 }
 0x2b5   : > { %1995 = vpow2.f32 %v1239_v19 }
 0x2ba   : > { %v1994_v21 = vpop.eup %1993 }
 0x2bb   : > { %v1996_v22 = vpop.eup %1995  ;;  %v1259_v23 = vsel %vm1192_vm3, %v1994_v21, 0.0 }
 0x2bc   : > { %1260 = vadd.xlane.f32.xlu2 %v1259_v23  ;;  %v1262_v24 = vsel %vm1192_vm3, %v1996_v22, 0.0 }
 0x2bd   : > { %1263 = vadd.xlane.f32.xlu0 %v1262_v24  ;;  %v1850_v24 = vld [vmem:[#allocation14 + $0x8] sm:$0xff] }
 0x2f7   : > { %v1243_v28 = vpop.xlane.xlu2 %1242 }
 0x2f8   : > { %1997 = vrcp.f32 %v1243_v28 }
 0x2fe   : > { %v1998_v30 = vpop.eup %1997 }
 0x2ff   : > { %v1246_v29 = vpop.xlane.xlu0 %1245  ;;  %v1273_v32 = vmul.f32 %v1998_v30, %v1982_v53 }
 0x300   : > { %1999 = vrcp.f32 %v1246_v29 }
 0x306   : > { %v2000_v31 = vpop.eup %1999 }
 0x307   : > { %v1274_v33 = vmul.f32 %v2000_v31, %v1984_v56 }
 0x309   : > { %v1281_v34 = vpack.c.bf16 %v1274_v33, %v1273_v32 }
 0x30b   : > { %1815 = vmatmul.msk.bf16.vlgmr.msra.gmra.mxu3 %vm1192_vm3, %v1281_v34  ;;  %v1849_v34 = vld [vmem:[#allocation14] sm:$0xff] }
 0x30f   : > { %v1249_v35 = vpop.xlane.xlu1 %1248 }
 0x310   : > { %2001 = vrcp.f32 %v1249_v35 }
 0x316   : > { %v2002_v37 = vpop.eup %2001 }
 0x317   : > { %v1252_v36 = vpop.xlane.xlu2 %1251  ;;  %v1275_v39 = vmul.f32 %v2002_v37, %v1986_v63 }
 0x318   : > { %2003 = vrcp.f32 %v1252_v36 }
 0x31e   : > { %v2004_v38 = vpop.eup %2003 }
 0x31f   : > { %v1276_v40 = vmul.f32 %v2004_v38, %v1988_v4  ;;  %v1255_v42 = vpop.xlane.xlu0 %1254 }
 0x320   : > { %2005 = vrcp.f32 %v1255_v42 }
 0x321   : > { %v1282_v41 = vpack.c.bf16 %v1276_v40, %v1275_v39 }
 0x323   : > { %1816 = vmatmul.msk.bf16.gmra.mxu3 %vm1192_vm3, %v1282_v41 }
 0x326   : > { %v2006_v44 = vpop.eup %2005 }
 0x327   : > { %v1258_v43 = vpop.xlane.xlu1 %1257  ;;  %v1277_v46 = vmul.f32 %v2006_v44, %v1990_v10  ;;  %v1852_v10 = vld [vmem:[#allocation14 + $0x18] sm:$0xff] }
 0x328   : > { %2007 = vrcp.f32 %v1258_v43  ;;  %1476 = vmatpush.bf16.msrb.mxu0 %v1852_v10 }
 0x32e   : > { %v2008_v45 = vpop.eup %2007 }
 0x32f   : > { %v1278_v47 = vmul.f32 %v2008_v45, %v1992_v17  ;;  %v1261_v48 = vpop.xlane.xlu2 %1260  ;;  %v1851_v17 = vld [vmem:[#allocation14 + $0x10] sm:$0xff] }
 0x330   : > { %v1264_v49 = vpop.xlane.xlu0 %1263  ;;  %2009 = vrcp.f32 %v1261_v48  ;;  %1477 = vmatpush.bf16.msrb.mxu0 %v1851_v17 }
 0x331   : > { %v1283_v50 = vpack.c.bf16 %v1278_v47, %v1277_v46  ;;  %2011 = vrcp.f32 %v1264_v49 }
 0x333   : > { %1817 = vmatmul.msk.bf16.gmra.mxu3 %vm1192_vm3, %v1283_v50 }
 0x334   : > { %1478 = vmatpush.bf16.msrb.mxu0 %v1850_v24 }
 0x336   : > { %v2010_v51 = vpop.eup %2009 }
 0x337   : > { %v2012_v52 = vpop.eup %2011  ;;  %v1279_v53 = vmul.f32 %v2010_v51, %v1994_v21 }
 0x338   : > { %v1280_v54 = vmul.f32 %v2012_v52, %v1996_v22  ;;  %1479 = vmatpush.bf16.msrb.mxu0 %v1849_v34 }
 0x33a   : > { %v1284_v55 = vpack.c.bf16 %v1280_v54, %v1279_v53 }
 0x343   : > { %1818 = vmatmul.msk.bf16.gmra.mxu3 %vm1192_vm3, %v1284_v55 }
 0x38e   : > { %v1310_v56 = vpop.f32.mrf.mxu3 }
 0x38f   : > { %v1330_v63 = vmul.f32 %v1310_v56, %v2670_v27 }
 0x391   : > { %v1338_v4 = vsel %vm780_vm0, %v1330_v63, 0.0 }
 0x392   : > { %v1339_v11 = vrot.slane %v1338_v4, 4 }
 0x394   : > { %v1340_v20 = vadd.f32 %v1339_v11, %v1338_v4 }
 0x396   : > { %v1312_v57 = vpop.f32.mrf.mxu3  ;;  %v1341_v29 = vrot.slane %v1340_v20, 2 }
 0x397   : > { %v1331_v60 = vmul.f32 %v1312_v57, %v2670_v27 }
 0x398   : > { %v1342_v39 = vadd.f32 %v1341_v29, %v1340_v20 }
 0x399   : > { %v1345_v2 = vsel %vm780_vm0, %v1331_v60, 0.0 }
 0x39a   : > { %v1346_v6 = vrot.slane %v1345_v2, 4  ;;  %v1343_v47 = vrot.slane %v1342_v39, 1 }
 0x39c   : > { %v1347_v16 = vadd.f32 %v1346_v6, %v1345_v2 }
 0x39e   : > { %v1348_v25 = vrot.slane %v1347_v16, 2 }
 0x3a0   : > { %v1349_v35 = vadd.f32 %v1348_v25, %v1347_v16 }
 0x3a2   : > { %v1350_v43 = vrot.slane %v1349_v35, 1 }
 0x3a4   : > { %v1351_v53 = vadd.f32 %v1350_v43, %v1349_v35 }
 0x3a6   : > { %v1315_v58 = vpop.f32.mrf.mxu3  ;;  %v1403_v63 = vpack.c.bf16 %v1351_v53, %v1351_v53 }
 0x3a7   : > { %v1332_v61 = vmul.f32 %v1315_v58, %v2670_v27  ;;  %v1344_v58 = vadd.f32 %v1343_v47, %v1342_v39 }
 0x3a9   : > { %v1352_v3 = vsel %vm780_vm0, %v1332_v61, 0.0  ;;  %v1402_v4 = vpack.c.bf16 %v1344_v58, %v1344_v58 }
 0x3aa   : > { %v1353_v9 = vrot.slane %v1352_v3, 4 }
 0x3ac   : > { %v1354_v18 = vadd.f32 %v1353_v9, %v1352_v3 }
 0x3ae   : > { %v1317_v59 = vpop.f32.mrf.mxu3  ;;  %v1355_v28 = vrot.slane %v1354_v18, 2 }
 0x3af   : > { %v1333_v0 = vmul.f32 %v1317_v59, %v2670_v27 }
 0x3b0   : > { %v1356_v37 = vadd.f32 %v1355_v28, %v1354_v18 }
 0x3b1   : > { %v1359_v5 = vsel %vm780_vm0, %v1333_v0, 0.0 }
 0x3b2   : > { %v1360_v12 = vrot.slane %v1359_v5, 4  ;;  %v1357_v46 = vrot.slane %v1356_v37, 1 }
 0x3b4   : > { %v1361_v21 = vadd.f32 %v1360_v12, %v1359_v5  ;;  %v1358_v56 = vadd.f32 %v1357_v46, %v1356_v37  ;;  %v2368_v37 = vmov 64.0  }
 0x3b5   : > { %2013 = vrcp.f32 %v2368_v37 }
 0x3b6   : > { %v1320_v62 = vpop.f32.mrf.mxu3  ;;  %v1362_v30 = vrot.slane %v1361_v21, 2  ;;  %v1404_v2 = vpack.c.bf16 %v1358_v56, %v1358_v56 }
 0x3b7   : > { %v1334_v1 = vmul.f32 %v1320_v62, %v2670_v27 }
 0x3b8   : > { %v1363_v40 = vadd.f32 %v1362_v30, %v1361_v21  ;;  %v1424_v11 = vunpack.c.l.b16 %v1404_v2 }
 0x3b9   : > { %v1366_v7 = vsel %vm780_vm0, %v1334_v1, 0.0 }
 0x3ba   : > { %v1367_v14 = vrot.slane %v1366_v7, 4  ;;  %v1364_v48 = vrot.slane %v1363_v40, 1 }
 0x3bc   : > { %v1368_v23 = vadd.f32 %v1367_v14, %v1366_v7  ;;  %v1365_v59 = vadd.f32 %v1364_v48, %v1363_v40  ;;  %v1423_v7 = vunpack.c.l.b16 %v1403_v63 }
 0x3be   : > { %v1322_v13 = vpop.f32.mrf.mxu3  ;;  %v1369_v32 = vrot.slane %v1368_v23, 2  ;;  %v1405_v5 = vpack.c.bf16 %v1365_v59, %v1365_v59 }
 0x3bf   : > { %v1335_v15 = vmul.f32 %v1322_v13, %v2670_v27  ;;  %v1422_v13 = vunpack.c.l.b16 %v1402_v4 }
 0x3c0   : > { %v1370_v42 = vadd.f32 %v1369_v32, %v1368_v23  ;;  %v1425_v14 = vunpack.c.l.b16 %v1405_v5 }
 0x3c1   : > { %v1373_v19 = vsel %vm780_vm0, %v1335_v15, 0.0  ;;  %v1431_v17 = vsel %vm1430_vm5, %v1423_v7, %v1422_v13 }
 0x3c2   : > { %v1374_v22 = vrot.slane %v1373_v19, 4  ;;  %v1371_v51 = vrot.slane %v1370_v42, 1  ;;  %v1433_v20 = vsel %vm1432_vm6, %v1424_v11, %v1431_v17 }
 0x3c4   : > { %v1375_v26 = vadd.f32 %v1374_v22, %v1373_v19  ;;  %v1372_v62 = vadd.f32 %v1371_v51, %v1370_v42  ;;  %v1435_v22 = vsel %vm1434_vm7, %v1425_v14, %v1433_v20 }
 0x3c6   : > { %v1325_v31 = vpop.f32.mrf.mxu3  ;;  %v1376_v36 = vrot.slane %v1375_v26, 2 }
 0x3c7   : > { %v1336_v33 = vmul.f32 %v1325_v31, %v2670_v27  ;;  %v1978_v31 = vld [vmem:[%s2907_s11] ss:$0 sm:$0xff] }
 0x3c8   : > { %v1377_v44 = vadd.f32 %v1376_v36, %v1375_v26 }
 0x3c9   : > { %v1380_v38 = vsel %vm780_vm0, %v1336_v33, 0.0 }
 0x3ca   : > { %v1381_v41 = vrot.slane %v1380_v38, 4  ;;  %v1378_v54 = vrot.slane %v1377_v44, 1 }
 0x3cc   : > { %v1382_v45 = vadd.f32 %v1381_v41, %v1380_v38  ;;  %v1379_v0 = vadd.f32 %v1378_v54, %v1377_v44  ;;  %v2014_v38 = vpop.eup %2013 }
 0x3cd   : > { %v1490_v39 = vmul.f32 64.0, %v2014_v38  ;;  %vm1494_vm12 = vweird.f32 %v2014_v38 }
 0x3ce   : > { %v1383_v49 = vrot.slane %v1382_v45, 2  ;;  %v1327_v50 = vpop.f32.mrf.mxu3  ;;  %v1407_v9 = vpack.c.bf16 %v1379_v0, %v1379_v0 }
 0x3cf   : > { %v1337_v52 = vmul.f32 %v1327_v50, %v2670_v27  ;;  %v1406_v27 = vpack.c.bf16 %v1372_v62, %v1372_v62  ;;  %v1491_v40 = vsub.f32 1.0, %v1490_v39 }
 0x3d0   : > { %v1384_v55 = vadd.f32 %v1383_v49, %v1382_v45  ;;  %v1427_v18 = vunpack.c.l.b16 %v1407_v9 }
 0x3d1   : > { %v1387_v57 = vsel %vm780_vm0, %v1337_v52, 0.0  ;;  %v1426_v16 = vunpack.c.l.b16 %v1406_v27  ;;  %v1492_v41 = vmul.f32 %v2014_v38, %v1491_v40 }
 0x3d2   : > { %v1385_v60 = vrot.slane %v1384_v55, 1  ;;  %v1388_v61 = vrot.slane %v1387_v57, 4 }
 0x3d3   : > { %v1437_v24 = vsel %vm1436_vm8, %v1426_v16, %v1435_v22  ;;  %v1493_v42 = vadd.f32 %v2014_v38, %v1492_v41 }
 0x3d4   : > { %v1389_v1 = vadd.f32 %v1388_v61, %v1387_v57  ;;  %v1386_v3 = vadd.f32 %v1385_v60, %v1384_v55  ;;  %v1439_v25 = vsel %vm1438_vm9, %v1427_v18, %v1437_v24  ;;  %v1979_v57 = vld [vmem:[%s2908_s25] ss:$0 sm:$0xff] }
 0x3d5   : > { %v1495_v43 = vsel %vm1494_vm12, %v2014_v38, %v1493_v42  ;;  %v1980_v60 = vld [vmem:[%s2912_s13] ss:$0 sm:$0xff] }
 0x3d6   : > { %v1390_v6 = vrot.slane %v1389_v1, 2  ;;  %v1408_v12 = vpack.c.bf16 %v1386_v3, %v1386_v3 }
 0x3d8   : > { %v1391_v10 = vadd.f32 %v1390_v6, %v1389_v1  ;;  %v1428_v21 = vunpack.c.l.b16 %v1408_v12 }
 0x3da   : > { %v1392_v15 = vrot.slane %v1391_v10, 1  ;;  %v1441_v28 = vsel %vm1440_vm10, %v1428_v21, %v1439_v25 }
 0x3dc   : > { %v1393_v19 = vadd.f32 %v1392_v15, %v1391_v10 }
 0x3de   : > { %v1409_v23 = vpack.c.bf16 %v1393_v19, %v1393_v19 }
 0x3e0   : > { %v1429_v26 = vunpack.c.l.b16 %v1409_v23 }
 0x3e2   : > { %v1443_v29 = vsel %vm1442_vm11, %v1429_v26, %v1441_v28 }
 0x3e3   : > { %v1444_v30 = vpack.c.b16 %v1443_v29, %v1443_v29 }
 0x3e5   : > { %1835 = vmatmul.msk.bf16.vlgmr.msrb.gmra.mxu0 %vm780_vm0, %v1444_v30 }
 0x462   : > { %v1481_v32 = vpop.f32.mrf.mxu0 }
 0x463   : > { %v1482_v33 = vadd.f32 %v1978_v31, %v1481_v32 }
 0x465   : > { %v1485_v34 = vadd.f32 %v1482_v33, %v2652_v8 }
 0x467   : > { %v1486_v35 = vsel %vm780_vm0, %v1485_v34, 0.0 }
 0x468   : > { %1487 = vadd.xlane.f32.xlu1 %v1486_v35 }
 0x46a   : > { %v1483_v36 = vpop.f32.mrf.mxu0 }
 0x4db   : > { %v1488_v44 = vpop.xlane.xlu1 %1487 }
 0x4dc   : > { %v1496_v45 = vmul.f32 %v1495_v43, %v1488_v44 }
 0x4de   : > { %v1497_v46 = vsub.f32 %v1485_v34, %v1496_v45 }
 0x4e0   : > { %v1498_v47 = vmul.f32 %v1497_v46, %v1497_v46 }
 0x4e2   : > { %v1499_v8 = vsel %vm780_vm0, %v1498_v47, 0.0 }
 0x4e3   : > { %1500 = vadd.xlane.f32.xlu2 %v1499_v8 }
 0x556   : > { %v1501_v48 = vpop.xlane.xlu2 %1500 }
 0x557   : > { %v1502_v49 = vmul.f32 %v1501_v48, %v1495_v43 }
 0x559   : > { %v1503_v50 = vadd.f32 1e-12, %v1502_v49 }
 0x55b   : > { %2015 = vrsqrt.f32 %v1503_v50  ;;  %vm1510_vm14 = vweird.f32 %v1503_v50 }
 0x561   : > { %v2016_v51 = vpop.eup %2015 }
 0x562   : > { %v1505_v52 = vmul.f32 %v2016_v51, %v1503_v50  ;;  %vm1511_vm13 = vweird.f32 %v2016_v51 }
 0x563   : > { %vm1512_vm15 = vmor %vm1510_vm14, %vm1511_vm13 }
 0x564   : > { %v1506_v53 = vmul.f32 %v2016_v51, %v1505_v52 }
 0x566   : > { %v1507_v54 = vmul.f32 0.5, %v1506_v53 }
 0x568   : > { %v1508_v55 = vsub.f32 1.5, %v1507_v54 }
 0x56a   : > { %v1509_v56 = vmul.f32 %v2016_v51, %v1508_v55 }
 0x56c   : > { %v1513_v58 = vsel %vm1512_vm15, %v2016_v51, %v1509_v56 }
 0x56d   : > { %v1514_v59 = vmul.f32 %v1513_v58, %v1497_v46 }
 0x56f   : > { %v1519_v61 = vmul.f32 %v1979_v57, %v1514_v59 }
 0x571   : > { %v1524_v62 = vadd.f32 %v1980_v60, %v1519_v61 }
 0x573   : > { %1525 = vst.msk [vmem:[%s724_s6] sm:$0xff] %vm780_vm0, %v1524_v62 }
 0x574   : > { %2284 = shalt.err (!%p2281_p13)
}
 0x575   : > { %1877 = dma.vmem_to_hbm [thread:$0]  (%p2535_p7), %s1541_s28, 128, %s1543_s12, %s1527_s4  }
 0x576 PF: > { %s2913_s8 = sld [smem:[#allocation24_spill]]  ;;  %p2915_p0 = scmp.ge.s32.totalorder %s2359_s23, 2 }
 0x578   : > { %p1906_p3 = pnand %p2915_p0, %p2494_p6 }
 0x57a   : > { %p1907_p5 = pneg %p1906_p3 }
 0x57c   : > { %s1554_s16 = sand.u32 1, %s2913_s8  }
 0x57d   : > { %s1555_s14 = scalar_lea.sflag [#allocation4], %s1554_s16 }
 0x57e   : > { %2334 = dma.done.wait (%p1907_p5), %s1555_s14, 128  }
 0x57f   : > { %2336 = vsyncadd (%p1907_p5), %s1555_s14, 4294967168  ;;  %s39_s23 = sadd.s32 1, %s2359_s23   ;;  %s2916_s25 = sld [smem:[#allocation25_spill]] }
 0x580   : > { %p36_p10 = scmp.ge.s32.totalorder %s39_s23, 4   ;;  %s2917_s20 = sld [smem:[#allocation30_spill]] }
 0x581   : > { %s2918_s29 = sld [smem:[#allocation28_spill]]  ;;  %s2919_s18 = smov %s2343_s19 }
 0x582   : > { %s2921_s21 = smov %s2355_s22 }
 0x583   :  { %38 = sbr.rel (!%p36_p10) target bundleno = 26 (0x1a), region = 181 }
 0x585   : > { %s2920_s19 = smov %s2916_s25 }
 0x587   : > { %s2922_s22 = smov %s2918_s29 }
 0x588   :  { %1561 = vsyncpa [#allocation3], 1 }
 0x589   :  { %1563 = vsyncpa [#allocation3 + $0x1], 1 }
 0x58a   :  { %1564 = vsyncpa [#allocation6], 1 }
 0x58b   :  { %1566 = vsyncpa [#allocation6 + $0x1], 1 }
 0x58c   :  { %1567 = vsyncpa [#allocation9], 1 }
 0x58d   :  { %1569 = vsyncpa [#allocation9 + $0x1], 1 }
 0x58e   :  { %1570 = vsyncpa [#allocation12], 1 }
 0x58f   :  { %1571 = vsyncpa [#allocation15], 1 }
 0x590   :  { %1572 = vsyncpa [#allocation4], 1 }
 0x591   :  { %1574 = vsyncpa [#allocation4 + $0x1], 1 }

</bundles_post_ra>
